<compile_context>
chip_gen: v7x
topology: tpu7x:2x2x1
jax: 0.10.0
libtpu: 0.0.40
codegen_flags: <defaults>
</compile_context>

<pallas_src>
import jax
import jax.numpy as jnp
from jax import lax
from jax.experimental import pallas as pl
from jax.experimental.pallas import tpu as pltpu

# ---- module hyper-parameters (mirrors LSTM.__init__ arguments) -------------
VOCAB_SIZE = 50
EMBED_DIM = 32
HIDDEN_DIM = 32
OUTPUT_DIM = 4
N_LAYERS = 2
BIDIRECTIONAL = True
DROPOUT_RATE = 0.5     # identity at inference
PAD_INDEX = 0

BATCH = 2
SEQ = 8

BATCH_PAD = 8                      # f32 sublane tile
VOCAB_PAD = 128                    # full lane tile for the one-hot / emb matmul

assert BIDIRECTIONAL and N_LAYERS >= 1, "kernel is written for the bi-LSTM config"
assert HIDDEN_DIM & (HIDDEN_DIM - 1) == 0, "lane-group select uses a power-of-2 H"

_VMEM_SPEC = pl.BlockSpec(memory_space=pltpu.MemorySpace.VMEM)


# ---------------------------------------------------------------------------
# Fused Pallas kernel: embedding + all LSTM layers (both dirs) + FC head
# ---------------------------------------------------------------------------
def _make_fused_kernel(n_layers):
    def kernel(*refs):
        tok_ref, len_ref, emb_ref = refs[0], refs[1], refs[2]
        layer_refs = [refs[3 + 3 * l: 3 + 3 * (l + 1)] for l in range(n_layers)]
        base = 3 + 3 * n_layers
        fcw_ref, fcb_ref = refs[base], refs[base + 1]
        logits_ref = refs[base + 2]
        gin_scr, out_scr = refs[base + 3], refs[base + 4]

        H = HIDDEN_DIM
        BP = len_ref.shape[0]
        TB = tok_ref.shape[0]
        T = TB // BP
        G2 = 2 * H                  # 64: lane-stacked hidden width [fwd | bwd]
        GL = 4 * G2                 # 256: interleaved gate lanes

        # ---- hoisted constants (built once, reused by every step/layer) ----
        lane_g = lax.broadcasted_iota(jnp.int32, (BP, GL), 1)
        fwd_gate_lane = (lane_g & H) == 0          # fwd slot within each 2H gate group
        lane_h = lax.broadcasted_iota(jnp.int32, (BP, G2), 1)
        fwd_h_lane = lane_h < H                    # fwd half of the stacked hidden

        # per-step validity masks (packed-sequence semantics), hoisted out of
        # both the time loop and the layer loop
        len_col = len_ref[...]                     # (BP, 1) int32
        keeps = []
        for t in range(T):
            step_lane = jnp.where(fwd_h_lane, t, T - 1 - t)   # (BP, 2H) int32
            keeps.append(step_lane < len_col)                 # (BP, 2H) bool

        # ---- embedding lookup as one-hot @ table on the MXU (pad rows 0) ----
        tok = tok_ref[...]                                            # (TB, 1)
        vocab = emb_ref.shape[0]
        onehot = (tok == lax.broadcasted_iota(jnp.int32, (TB, vocab), 1)
                  ).astype(jnp.float32)                               # (TB, 128)
        x0 = jnp.dot(onehot, emb_ref[...], preferred_element_type=jnp.float32)

        h = None
        for l in range(n_layers):
            win_ref, b_ref, whh_ref = layer_refs[l]
            whh = whh_ref[...]                     # hoisted once per layer (2H, 8H)

            # ---- fused fwd|bwd input projection (+ bias), one matmul ----
            x_in = x0 if l == 0 else out_scr[...]
            gin_scr[...] = jnp.dot(x_in, win_ref[...],
                                   preferred_element_type=jnp.float32) + b_ref[...]

            # ---- serial recurrence: both directions in one matmul / cell ----
            h = jnp.zeros((BP, G2), jnp.float32)   # [h_fwd | h_bwd]
            c = jnp.zeros((BP, G2), jnp.float32)
            write_seq = l < n_layers - 1
            for t in range(T):                     # static unroll (T is small)
                tb = T - 1 - t
                # fwd gate slots from time t, bwd slots from time T-1-t
                gin_t = gin_scr[t * BP:(t + 1) * BP, :]
                gin_tb = gin_scr[tb * BP:(tb + 1) * BP, :]
                gin = jnp.where(fwd_gate_lane, gin_t, gin_tb)          # (BP, 8H)

                gates = gin + jnp.dot(h, whh, preferred_element_type=jnp.float32)
                i_g = jax.nn.sigmoid(gates[:, 0 * G2:1 * G2])
                f_g = jax.nn.sigmoid(gates[:, 1 * G2:2 * G2])
                g_g = jnp.tanh(gates[:, 2 * G2:3 * G2])
                o_g = jax.nn.sigmoid(gates[:, 3 * G2:4 * G2])
                c_new = f_g * c + i_g * g_g
                h_new = o_g * jnp.tanh(c_new)

                keep = keeps[t]                    # (BP, 2H) bool
                h = jnp.where(keep, h_new, h)
                c = jnp.where(keep, c_new, c)

                if write_seq:                      # last layer's stream unused
                    out_scr[t * BP:(t + 1) * BP, 0:H] = h[:, 0:H]
                    out_scr[tb * BP:(tb + 1) * BP, H:G2] = h[:, H:G2]

        # ---- classifier head on the packed-sequence final hidden states ----
        # torch.cat([hidden[-1], hidden[-2]]) mapping is folded into fcw_ref.
        logits_ref[...] = jnp.dot(h, fcw_ref[...],
                                  preferred_element_type=jnp.float32) + fcb_ref[...]

    return kernel


# ---------------------------------------------------------------------------
# Parameters (deterministic, PyTorch-style init shapes)
# ---------------------------------------------------------------------------
def init_params(key):
    params = {}
    num_dirs = 2 if BIDIRECTIONAL else 1

    key, k_emb = jax.random.split(key)
    emb = jax.random.normal(k_emb, (VOCAB_SIZE, EMBED_DIM), jnp.float32)
    emb = emb.at[PAD_INDEX].set(0.0)              # padding_idx row is zero
    params["embedding"] = emb

    k = 1.0 / (HIDDEN_DIM ** 0.5)
    for layer in range(N_LAYERS):
        in_size = EMBED_DIM if layer == 0 else HIDDEN_DIM * num_dirs
        for d in range(num_dirs):
            sfx = f"l{layer}" + ("_reverse" if d == 1 else "")
            key, k1, k2, k3, k4 = jax.random.split(key, 5)
            params[f"w_ih_{sfx}"] = jax.random.uniform(
                k1, (4 * HIDDEN_DIM, in_size), jnp.float32, -k, k)
            params[f"w_hh_{sfx}"] = jax.random.uniform(
                k2, (4 * HIDDEN_DIM, HIDDEN_DIM), jnp.float32, -k, k)
            params[f"b_ih_{sfx}"] = jax.random.uniform(
                k3, (4 * HIDDEN_DIM,), jnp.float32, -k, k)
            params[f"b_hh_{sfx}"] = jax.random.uniform(
                k4, (4 * HIDDEN_DIM,), jnp.float32, -k, k)

    fc_in = HIDDEN_DIM * num_dirs
    kf = 1.0 / (fc_in ** 0.5)
    key, k5, k6 = jax.random.split(key, 3)
    params["fc_w"] = jax.random.uniform(k5, (OUTPUT_DIM, fc_in), jnp.float32, -kf, kf)
    params["fc_b"] = jax.random.uniform(k6, (OUTPUT_DIM,), jnp.float32, -kf, kf)
    return params


def prepare_params(params):
    """One-time prep: transpose, fold b_ih+b_hh, build the fused/interleaved
    fwd|bwd weight layouts (gate g, direction d -> lanes [g*2H + d*H : +H])."""
    H = HIDDEN_DIM

    def interleave_dirs(wf_t, wb_t):
        # wf_t, wb_t: (D, 4H) PyTorch-gate-ordered (i,f,g,o) transposed weights
        d = wf_t.shape[0]
        out = jnp.zeros((d, 4, 2, H), jnp.float32)
        out = out.at[:, :, 0, :].set(wf_t.reshape(d, 4, H))
        out = out.at[:, :, 1, :].set(wb_t.reshape(d, 4, H))
        return out.reshape(d, 8 * H)

    emb_pad = jnp.zeros((VOCAB_PAD, EMBED_DIM), jnp.float32)
    emb_pad = emb_pad.at[:VOCAB_SIZE].set(params["embedding"])

    args = [emb_pad]
    for layer in range(N_LAYERS):
        sf, sb = f"l{layer}", f"l{layer}_reverse"
        # fused input projection weight (D_in, 8H) and bias (1, 8H)
        w_in = interleave_dirs(params[f"w_ih_{sf}"].T, params[f"w_ih_{sb}"].T)
        b_f = (params[f"b_ih_{sf}"] + params[f"b_hh_{sf}"]).reshape(1, 4 * H)
        b_b = (params[f"b_ih_{sb}"] + params[f"b_hh_{sb}"]).reshape(1, 4 * H)
        b_comb = interleave_dirs(b_f, b_b)
        # block-diagonal recurrent weight (2H, 8H): rows 0:H -> fwd lanes only,
        # rows H:2H -> bwd lanes only (zeros elsewhere -> no per-step LHS mask)
        whhf_t = params[f"w_hh_{sf}"].T             # (H, 4H)
        whhb_t = params[f"w_hh_{sb}"].T
        blk = jnp.zeros((2 * H, 4, 2, H), jnp.float32)
        blk = blk.at[0:H, :, 0, :].set(whhf_t.reshape(H, 4, H))
        blk = blk.at[H:2 * H, :, 1, :].set(whhb_t.reshape(H, 4, H))
        w_hh_blk = blk.reshape(2 * H, 8 * H)
        args += [w_in, b_comb, w_hh_blk]

    # fc_w: (OUT, 2H); cols [0:H] multiply hidden[-1] (bwd), [H:2H] hidden[-2] (fwd)
    fc_w = params["fc_w"]
    fc_comb = jnp.zeros((2 * H, OUTPUT_DIM), jnp.float32)
    fc_comb = fc_comb.at[0:H, :].set(fc_w[:, H:].T)      # fwd-final half of h
    fc_comb = fc_comb.at[H:, :].set(fc_w[:, :H].T)       # bwd-final half of h
    args += [fc_comb, params["fc_b"].reshape(1, -1)]
    return tuple(args)


# ---------------------------------------------------------------------------
# Forward pass: tiny glue + a single fused pallas_call
# ---------------------------------------------------------------------------
def model_forward(prepped, tokens, lengths):
    """tokens: (B, T) int32; lengths: (B,) int32 -> logits (B, OUTPUT_DIM)."""
    B, T = tokens.shape
    BP = BATCH_PAD
    H = HIDDEN_DIM
    assert B <= BP

    tok_p = jnp.full((BP, T), PAD_INDEX, jnp.int32).at[:B, :].set(tokens.astype(jnp.int32))
    tok_flat = tok_p.T.reshape(T * BP, 1)                 # time-major, row t*BP + b
    len_p = jnp.zeros((BP, 1), jnp.int32).at[:B, 0].set(lengths.astype(jnp.int32))

    n_in = 3 + 3 * N_LAYERS + 2
    logits_pad = pl.pallas_call(
        _make_fused_kernel(N_LAYERS),
        out_shape=jax.ShapeDtypeStruct((BP, OUTPUT_DIM), jnp.float32),
        in_specs=[_VMEM_SPEC] * n_in,
        out_specs=_VMEM_SPEC,
        scratch_shapes=[
            pltpu.VMEM((T * BP, 8 * H), jnp.float32),     # fused gin stream (both dirs)
            pltpu.VMEM((T * BP, 2 * H), jnp.float32),     # prev-layer [fwd|bwd] outputs
        ],
    )(tok_flat, len_p, *prepped)

    # self.drop(...) layers are identity at inference.
    return logits_pad[:B]


# ---------------------------------------------------------------------------
if __name__ == "__main__":
    key = jax.random.PRNGKey(0)
    params = init_params(key)
    prepped = prepare_params(params)              # one-time parameter prep

    key, k_tok = jax.random.split(key)
    tokens = jax.random.randint(k_tok, (BATCH, SEQ), 1, VOCAB_SIZE, jnp.int32)
    x_len = jnp.array([SEQ, 5], dtype=jnp.int32)  # variable (unsorted-friendly) lengths
    t_idx = jnp.arange(SEQ)[None, :]
    tokens = jnp.where(t_idx < x_len[:, None], tokens, PAD_INDEX)

    logits = jax.jit(model_forward)(prepped, tokens, x_len)
    jax.block_until_ready(logits)

    assert logits.shape == (BATCH, OUTPUT_DIM) and logits.dtype == jnp.float32
    print("KERNEL_OK")
</pallas_src>

<mosaic_0001>
module attributes {stable_mosaic.version = 11 : i64} {
  func.func @kernel(%arg0: memref<64x1xi32, #tpu.memory_space<vmem>>, %arg1: memref<8x1xi32, #tpu.memory_space<vmem>>, %arg2: memref<128x32xf32, #tpu.memory_space<vmem>>, %arg3: memref<32x256xf32, #tpu.memory_space<vmem>>, %arg4: memref<1x256xf32, #tpu.memory_space<vmem>>, %arg5: memref<64x256xf32, #tpu.memory_space<vmem>>, %arg6: memref<64x256xf32, #tpu.memory_space<vmem>>, %arg7: memref<1x256xf32, #tpu.memory_space<vmem>>, %arg8: memref<64x256xf32, #tpu.memory_space<vmem>>, %arg9: memref<64x4xf32, #tpu.memory_space<vmem>>, %arg10: memref<1x4xf32, #tpu.memory_space<vmem>>, %arg11: memref<8x4xf32, #tpu.memory_space<vmem>>, %arg12: memref<64x256xf32, #tpu.memory_space<vmem>>, %arg13: memref<64x64xf32, #tpu.memory_space<vmem>>) attributes {dimension_semantics = [], scalar_prefetch = 0 : i64, scratch_operands = 2 : i64, tpu.core_type = #tpu.core_type<tc>} {
    %0 = tpu.iota {dimensions = array<i32: 1>} : vector<8x256xi32>
    %c32_i32 = arith.constant 32 : i32
    %1 = vector.broadcast %c32_i32 : i32 to vector<8x256xi32>
    %2 = arith.andi %0, %1 : vector<8x256xi32>
    %c0_i32 = arith.constant 0 : i32
    %3 = vector.broadcast %c0_i32 : i32 to vector<8x256xi32>
    %4 = arith.cmpi eq, %2, %3 : vector<8x256xi32>
    %5 = tpu.iota {dimensions = array<i32: 1>} : vector<8x64xi32>
    %c32_i32_0 = arith.constant 32 : i32
    %6 = vector.broadcast %c32_i32_0 : i32 to vector<8x64xi32>
    %7 = arith.cmpi slt, %5, %6 : vector<8x64xi32>
    %c0 = arith.constant 0 : index
    %c0_1 = arith.constant 0 : index
    %8 = vector.load %arg1[%c0, %c0_1] : memref<8x1xi32, #tpu.memory_space<vmem>>, vector<8x1xi32>
    %c0_i32_2 = arith.constant 0 : i32
    %c7_i32 = arith.constant 7 : i32
    %9 = vector.broadcast %c0_i32_2 : i32 to vector<8x64xi32>
    %10 = vector.broadcast %c7_i32 : i32 to vector<8x64xi32>
    %11 = arith.select %7, %9, %10 : vector<8x64xi1>, vector<8x64xi32>
    %12 = vector.broadcast %8 : vector<8x1xi32> to vector<8x64xi32>
    %13 = arith.cmpi slt, %11, %12 : vector<8x64xi32>
    %c1_i32 = arith.constant 1 : i32
    %c6_i32 = arith.constant 6 : i32
    %14 = vector.broadcast %c1_i32 : i32 to vector<8x64xi32>
    %15 = vector.broadcast %c6_i32 : i32 to vector<8x64xi32>
    %16 = arith.select %7, %14, %15 : vector<8x64xi1>, vector<8x64xi32>
    %17 = vector.broadcast %8 : vector<8x1xi32> to vector<8x64xi32>
    %18 = arith.cmpi slt, %16, %17 : vector<8x64xi32>
    %c2_i32 = arith.constant 2 : i32
    %c5_i32 = arith.constant 5 : i32
    %19 = vector.broadcast %c2_i32 : i32 to vector<8x64xi32>
    %20 = vector.broadcast %c5_i32 : i32 to vector<8x64xi32>
    %21 = arith.select %7, %19, %20 : vector<8x64xi1>, vector<8x64xi32>
    %22 = vector.broadcast %8 : vector<8x1xi32> to vector<8x64xi32>
    %23 = arith.cmpi slt, %21, %22 : vector<8x64xi32>
    %c3_i32 = arith.constant 3 : i32
    %c4_i32 = arith.constant 4 : i32
    %24 = vector.broadcast %c3_i32 : i32 to vector<8x64xi32>
    %25 = vector.broadcast %c4_i32 : i32 to vector<8x64xi32>
    %26 = arith.select %7, %24, %25 : vector<8x64xi1>, vector<8x64xi32>
    %27 = vector.broadcast %8 : vector<8x1xi32> to vector<8x64xi32>
    %28 = arith.cmpi slt, %26, %27 : vector<8x64xi32>
    %c4_i32_3 = arith.constant 4 : i32
    %c3_i32_4 = arith.constant 3 : i32
    %29 = vector.broadcast %c4_i32_3 : i32 to vector<8x64xi32>
    %30 = vector.broadcast %c3_i32_4 : i32 to vector<8x64xi32>
    %31 = arith.select %7, %29, %30 : vector<8x64xi1>, vector<8x64xi32>
    %32 = vector.broadcast %8 : vector<8x1xi32> to vector<8x64xi32>
    %33 = arith.cmpi slt, %31, %32 : vector<8x64xi32>
    %c5_i32_5 = arith.constant 5 : i32
    %c2_i32_6 = arith.constant 2 : i32
    %34 = vector.broadcast %c5_i32_5 : i32 to vector<8x64xi32>
    %35 = vector.broadcast %c2_i32_6 : i32 to vector<8x64xi32>
    %36 = arith.select %7, %34, %35 : vector<8x64xi1>, vector<8x64xi32>
    %37 = vector.broadcast %8 : vector<8x1xi32> to vector<8x64xi32>
    %38 = arith.cmpi slt, %36, %37 : vector<8x64xi32>
    %c6_i32_7 = arith.constant 6 : i32
    %c1_i32_8 = arith.constant 1 : i32
    %39 = vector.broadcast %c6_i32_7 : i32 to vector<8x64xi32>
    %40 = vector.broadcast %c1_i32_8 : i32 to vector<8x64xi32>
    %41 = arith.select %7, %39, %40 : vector<8x64xi1>, vector<8x64xi32>
    %42 = vector.broadcast %8 : vector<8x1xi32> to vector<8x64xi32>
    %43 = arith.cmpi slt, %41, %42 : vector<8x64xi32>
    %c7_i32_9 = arith.constant 7 : i32
    %c0_i32_10 = arith.constant 0 : i32
    %44 = vector.broadcast %c7_i32_9 : i32 to vector<8x64xi32>
    %45 = vector.broadcast %c0_i32_10 : i32 to vector<8x64xi32>
    %46 = arith.select %7, %44, %45 : vector<8x64xi1>, vector<8x64xi32>
    %47 = vector.broadcast %8 : vector<8x1xi32> to vector<8x64xi32>
    %48 = arith.cmpi slt, %46, %47 : vector<8x64xi32>
    %c0_11 = arith.constant 0 : index
    %c0_12 = arith.constant 0 : index
    %49 = vector.load %arg0[%c0_11, %c0_12] : memref<64x1xi32, #tpu.memory_space<vmem>>, vector<64x1xi32>
    %50 = tpu.iota {dimensions = array<i32: 1>} : vector<64x128xi32>
    %51 = vector.broadcast %49 : vector<64x1xi32> to vector<64x128xi32>
    %52 = arith.cmpi eq, %51, %50 : vector<64x128xi32>
    %53 = arith.extui %52 : vector<64x128xi1> to vector<64x128xi32>
    %54 = arith.sitofp %53 : vector<64x128xi32> to vector<64x128xf32>
    %c0_13 = arith.constant 0 : index
    %c0_14 = arith.constant 0 : index
    %55 = vector.load %arg2[%c0_13, %c0_14] : memref<128x32xf32, #tpu.memory_space<vmem>>, vector<128x32xf32>
    %cst = arith.constant dense<0.000000e+00> : vector<64x32xf32>
    %56 = tpu.matmul %54, %55, %cst {dimension_numbers = #tpu.dot_dimension_numbers<[1], [0], [0], [1], [0, 0, 1, 1], [], []>} : vector<64x128xf32>, vector<128x32xf32>, vector<64x32xf32> -> vector<64x32xf32>
    %c0_15 = arith.constant 0 : index
    %c0_16 = arith.constant 0 : index
    %57 = vector.load %arg5[%c0_15, %c0_16] : memref<64x256xf32, #tpu.memory_space<vmem>>, vector<64x256xf32>
    %c0_17 = arith.constant 0 : index
    %c0_18 = arith.constant 0 : index
    %58 = vector.load %arg3[%c0_17, %c0_18] : memref<32x256xf32, #tpu.memory_space<vmem>>, vector<32x256xf32>
    %cst_19 = arith.constant dense<0.000000e+00> : vector<64x256xf32>
    %59 = tpu.matmul %56, %58, %cst_19 {dimension_numbers = #tpu.dot_dimension_numbers<[1], [0], [0], [1], [0, 0, 1, 1], [], []>} : vector<64x32xf32>, vector<32x256xf32>, vector<64x256xf32> -> vector<64x256xf32>
    %c0_20 = arith.constant 0 : index
    %c0_21 = arith.constant 0 : index
    %60 = vector.load %arg4[%c0_20, %c0_21] : memref<1x256xf32, #tpu.memory_space<vmem>>, vector<1x256xf32>
    %61 = vector.broadcast %60 : vector<1x256xf32> to vector<64x256xf32>
    %62 = arith.addf %59, %61 : vector<64x256xf32>
    %c0_22 = arith.constant 0 : index
    %c0_23 = arith.constant 0 : index
    %63 = vector.load %arg12[%c0_22, %c0_23] : memref<64x256xf32, #tpu.memory_space<vmem>>, vector<64x256xf32>
    tpu.vector_store %arg12[%c0_22, %c0_23], %62 {strides = array<i32>} : memref<64x256xf32, #tpu.memory_space<vmem>>, vector<64x256xf32>,
    %cst_24 = arith.constant 0.000000e+00 : f32
    %64 = vector.broadcast %cst_24 : f32 to vector<8x64xf32>
    %cst_25 = arith.constant 0.000000e+00 : f32
    %65 = vector.broadcast %cst_25 : f32 to vector<8x64xf32>
    %c0_26 = arith.constant 0 : index
    %c0_27 = arith.constant 0 : index
    %66 = vector.load %arg12[%c0_26, %c0_27] : memref<64x256xf32, #tpu.memory_space<vmem>>, vector<8x256xf32>
    %c56 = arith.constant 56 : index
    %c0_28 = arith.constant 0 : index
    %67 = vector.load %arg12[%c56, %c0_28] : memref<64x256xf32, #tpu.memory_space<vmem>>, vector<8x256xf32>
    %68 = arith.select %4, %66, %67 : vector<8x256xi1>, vector<8x256xf32>
    %cst_29 = arith.constant dense<0.000000e+00> : vector<8x256xf32>
    %69 = tpu.matmul %64, %57, %cst_29 {dimension_numbers = #tpu.dot_dimension_numbers<[1], [0], [0], [1], [0, 0, 1, 1], [], []>} : vector<8x64xf32>, vector<64x256xf32>, vector<8x256xf32> -> vector<8x256xf32>
    %70 = arith.addf %68, %69 : vector<8x256xf32>
    %71 = vector.extract_strided_slice %70 {offsets = [0, 0], sizes = [8, 64], strides = [1, 1]} : vector<8x256xf32> to vector<8x64xf32>
    %72 = arith.negf %71 : vector<8x64xf32>
    %73 = math.exp %72 : vector<8x64xf32>
    %cst_30 = arith.constant 1.000000e+00 : f32
    %74 = vector.broadcast %cst_30 : f32 to vector<8x64xf32>
    %75 = arith.addf %74, %73 : vector<8x64xf32>
    %76 = arith.divf %74, %75 : vector<8x64xf32>
    %77 = vector.extract_strided_slice %70 {offsets = [0, 64], sizes = [8, 64], strides = [1, 1]} : vector<8x256xf32> to vector<8x64xf32>
    %78 = arith.negf %77 : vector<8x64xf32>
    %79 = math.exp %78 : vector<8x64xf32>
    %cst_31 = arith.constant 1.000000e+00 : f32
    %80 = vector.broadcast %cst_31 : f32 to vector<8x64xf32>
    %81 = arith.addf %80, %79 : vector<8x64xf32>
    %82 = arith.divf %80, %81 : vector<8x64xf32>
    %83 = vector.extract_strided_slice %70 {offsets = [0, 128], sizes = [8, 64], strides = [1, 1]} : vector<8x256xf32> to vector<8x64xf32>
    %84 = math.tanh %83 : vector<8x64xf32>
    %85 = vector.extract_strided_slice %70 {offsets = [0, 192], sizes = [8, 64], strides = [1, 1]} : vector<8x256xf32> to vector<8x64xf32>
    %86 = arith.negf %85 : vector<8x64xf32>
    %87 = math.exp %86 : vector<8x64xf32>
    %cst_32 = arith.constant 1.000000e+00 : f32
    %88 = vector.broadcast %cst_32 : f32 to vector<8x64xf32>
    %89 = arith.addf %88, %87 : vector<8x64xf32>
    %90 = arith.divf %88, %89 : vector<8x64xf32>
    %91 = arith.mulf %82, %65 : vector<8x64xf32>
    %92 = arith.mulf %76, %84 : vector<8x64xf32>
    %93 = arith.addf %91, %92 : vector<8x64xf32>
    %94 = math.tanh %93 : vector<8x64xf32>
    %95 = arith.mulf %90, %94 : vector<8x64xf32>
    %96 = arith.select %13, %95, %64 : vector<8x64xi1>, vector<8x64xf32>
    %97 = arith.select %13, %93, %65 : vector<8x64xi1>, vector<8x64xf32>
    %98 = vector.extract_strided_slice %96 {offsets = [0, 0], sizes = [8, 32], strides = [1, 1]} : vector<8x64xf32> to vector<8x32xf32>
    %c0_33 = arith.constant 0 : index
    %c0_34 = arith.constant 0 : index
    %99 = vector.load %arg13[%c0_33, %c0_34] : memref<64x64xf32, #tpu.memory_space<vmem>>, vector<8x32xf32>
    tpu.vector_store %arg13[%c0_33, %c0_34], %98 {strides = array<i32>} : memref<64x64xf32, #tpu.memory_space<vmem>>, vector<8x32xf32>,
    %100 = vector.extract_strided_slice %96 {offsets = [0, 32], sizes = [8, 32], strides = [1, 1]} : vector<8x64xf32> to vector<8x32xf32>
    %c56_35 = arith.constant 56 : index
    %c32 = arith.constant 32 : index
    %101 = vector.load %arg13[%c56_35, %c32] : memref<64x64xf32, #tpu.memory_space<vmem>>, vector<8x32xf32>
    tpu.vector_store %arg13[%c56_35, %c32], %100 {strides = array<i32>} : memref<64x64xf32, #tpu.memory_space<vmem>>, vector<8x32xf32>,
    %c8 = arith.constant 8 : index
    %c0_36 = arith.constant 0 : index
    %102 = vector.load %arg12[%c8, %c0_36] : memref<64x256xf32, #tpu.memory_space<vmem>>, vector<8x256xf32>
    %c48 = arith.constant 48 : index
    %c0_37 = arith.constant 0 : index
    %103 = vector.load %arg12[%c48, %c0_37] : memref<64x256xf32, #tpu.memory_space<vmem>>, vector<8x256xf32>
    %104 = arith.select %4, %102, %103 : vector<8x256xi1>, vector<8x256xf32>
    %cst_38 = arith.constant dense<0.000000e+00> : vector<8x256xf32>
    %105 = tpu.matmul %96, %57, %cst_38 {dimension_numbers = #tpu.dot_dimension_numbers<[1], [0], [0], [1], [0, 0, 1, 1], [], []>} : vector<8x64xf32>, vector<64x256xf32>, vector<8x256xf32> -> vector<8x256xf32>
    %106 = arith.addf %104, %105 : vector<8x256xf32>
    %107 = vector.extract_strided_slice %106 {offsets = [0, 0], sizes = [8, 64], strides = [1, 1]} : vector<8x256xf32> to vector<8x64xf32>
    %108 = arith.negf %107 : vector<8x64xf32>
    %109 = math.exp %108 : vector<8x64xf32>
    %cst_39 = arith.constant 1.000000e+00 : f32
    %110 = vector.broadcast %cst_39 : f32 to vector<8x64xf32>
    %111 = arith.addf %110, %109 : vector<8x64xf32>
    %112 = arith.divf %110, %111 : vector<8x64xf32>
    %113 = vector.extract_strided_slice %106 {offsets = [0, 64], sizes = [8, 64], strides = [1, 1]} : vector<8x256xf32> to vector<8x64xf32>
    %114 = arith.negf %113 : vector<8x64xf32>
    %115 = math.exp %114 : vector<8x64xf32>
    %cst_40 = arith.constant 1.000000e+00 : f32
    %116 = vector.broadcast %cst_40 : f32 to vector<8x64xf32>
    %117 = arith.addf %116, %115 : vector<8x64xf32>
    %118 = arith.divf %116, %117 : vector<8x64xf32>
    %119 = vector.extract_strided_slice %106 {offsets = [0, 128], sizes = [8, 64], strides = [1, 1]} : vector<8x256xf32> to vector<8x64xf32>
    %120 = math.tanh %119 : vector<8x64xf32>
    %121 = vector.extract_strided_slice %106 {offsets = [0, 192], sizes = [8, 64], strides = [1, 1]} : vector<8x256xf32> to vector<8x64xf32>
    %122 = arith.negf %121 : vector<8x64xf32>
    %123 = math.exp %122 : vector<8x64xf32>
    %cst_41 = arith.constant 1.000000e+00 : f32
    %124 = vector.broadcast %cst_41 : f32 to vector<8x64xf32>
    %125 = arith.addf %124, %123 : vector<8x64xf32>
    %126 = arith.divf %124, %125 : vector<8x64xf32>
    %127 = arith.mulf %118, %97 : vector<8x64xf32>
    %128 = arith.mulf %112, %120 : vector<8x64xf32>
    %129 = arith.addf %127, %128 : vector<8x64xf32>
    %130 = math.tanh %129 : vector<8x64xf32>
    %131 = arith.mulf %126, %130 : vector<8x64xf32>
    %132 = arith.select %18, %131, %96 : vector<8x64xi1>, vector<8x64xf32>
    %133 = arith.select %18, %129, %97 : vector<8x64xi1>, vector<8x64xf32>
    %134 = vector.extract_strided_slice %132 {offsets = [0, 0], sizes = [8, 32], strides = [1, 1]} : vector<8x64xf32> to vector<8x32xf32>
    %c8_42 = arith.constant 8 : index
    %c0_43 = arith.constant 0 : index
    %135 = vector.load %arg13[%c8_42, %c0_43] : memref<64x64xf32, #tpu.memory_space<vmem>>, vector<8x32xf32>
    tpu.vector_store %arg13[%c8_42, %c0_43], %134 {strides = array<i32>} : memref<64x64xf32, #tpu.memory_space<vmem>>, vector<8x32xf32>,
    %136 = vector.extract_strided_slice %132 {offsets = [0, 32], sizes = [8, 32], strides = [1, 1]} : vector<8x64xf32> to vector<8x32xf32>
    %c48_44 = arith.constant 48 : index
    %c32_45 = arith.constant 32 : index
    %137 = vector.load %arg13[%c48_44, %c32_45] : memref<64x64xf32, #tpu.memory_space<vmem>>, vector<8x32xf32>
    tpu.vector_store %arg13[%c48_44, %c32_45], %136 {strides = array<i32>} : memref<64x64xf32, #tpu.memory_space<vmem>>, vector<8x32xf32>,
    %c16 = arith.constant 16 : index
    %c0_46 = arith.constant 0 : index
    %138 = vector.load %arg12[%c16, %c0_46] : memref<64x256xf32, #tpu.memory_space<vmem>>, vector<8x256xf32>
    %c40 = arith.constant 40 : index
    %c0_47 = arith.constant 0 : index
    %139 = vector.load %arg12[%c40, %c0_47] : memref<64x256xf32, #tpu.memory_space<vmem>>, vector<8x256xf32>
    %140 = arith.select %4, %138, %139 : vector<8x256xi1>, vector<8x256xf32>
    %cst_48 = arith.constant dense<0.000000e+00> : vector<8x256xf32>
    %141 = tpu.matmul %132, %57, %cst_48 {dimension_numbers = #tpu.dot_dimension_numbers<[1], [0], [0], [1], [0, 0, 1, 1], [], []>} : vector<8x64xf32>, vector<64x256xf32>, vector<8x256xf32> -> vector<8x256xf32>
    %142 = arith.addf %140, %141 : vector<8x256xf32>
    %143 = vector.extract_strided_slice %142 {offsets = [0, 0], sizes = [8, 64], strides = [1, 1]} : vector<8x256xf32> to vector<8x64xf32>
    %144 = arith.negf %143 : vector<8x64xf32>
    %145 = math.exp %144 : vector<8x64xf32>
    %cst_49 = arith.constant 1.000000e+00 : f32
    %146 = vector.broadcast %cst_49 : f32 to vector<8x64xf32>
    %147 = arith.addf %146, %145 : vector<8x64xf32>
    %148 = arith.divf %146, %147 : vector<8x64xf32>
    %149 = vector.extract_strided_slice %142 {offsets = [0, 64], sizes = [8, 64], strides = [1, 1]} : vector<8x256xf32> to vector<8x64xf32>
    %150 = arith.negf %149 : vector<8x64xf32>
    %151 = math.exp %150 : vector<8x64xf32>
    %cst_50 = arith.constant 1.000000e+00 : f32
    %152 = vector.broadcast %cst_50 : f32 to vector<8x64xf32>
    %153 = arith.addf %152, %151 : vector<8x64xf32>
    %154 = arith.divf %152, %153 : vector<8x64xf32>
    %155 = vector.extract_strided_slice %142 {offsets = [0, 128], sizes = [8, 64], strides = [1, 1]} : vector<8x256xf32> to vector<8x64xf32>
    %156 = math.tanh %155 : vector<8x64xf32>
    %157 = vector.extract_strided_slice %142 {offsets = [0, 192], sizes = [8, 64], strides = [1, 1]} : vector<8x256xf32> to vector<8x64xf32>
    %158 = arith.negf %157 : vector<8x64xf32>
    %159 = math.exp %158 : vector<8x64xf32>
    %cst_51 = arith.constant 1.000000e+00 : f32
    %160 = vector.broadcast %cst_51 : f32 to vector<8x64xf32>
    %161 = arith.addf %160, %159 : vector<8x64xf32>
    %162 = arith.divf %160, %161 : vector<8x64xf32>
    %163 = arith.mulf %154, %133 : vector<8x64xf32>
    %164 = arith.mulf %148, %156 : vector<8x64xf32>
    %165 = arith.addf %163, %164 : vector<8x64xf32>
    %166 = math.tanh %165 : vector<8x64xf32>
    %167 = arith.mulf %162, %166 : vector<8x64xf32>
    %168 = arith.select %23, %167, %132 : vector<8x64xi1>, vector<8x64xf32>
    %169 = arith.select %23, %165, %133 : vector<8x64xi1>, vector<8x64xf32>
    %170 = vector.extract_strided_slice %168 {offsets = [0, 0], sizes = [8, 32], strides = [1, 1]} : vector<8x64xf32> to vector<8x32xf32>
    %c16_52 = arith.constant 16 : index
    %c0_53 = arith.constant 0 : index
    %171 = vector.load %arg13[%c16_52, %c0_53] : memref<64x64xf32, #tpu.memory_space<vmem>>, vector<8x32xf32>
    tpu.vector_store %arg13[%c16_52, %c0_53], %170 {strides = array<i32>} : memref<64x64xf32, #tpu.memory_space<vmem>>, vector<8x32xf32>,
    %172 = vector.extract_strided_slice %168 {offsets = [0, 32], sizes = [8, 32], strides = [1, 1]} : vector<8x64xf32> to vector<8x32xf32>
    %c40_54 = arith.constant 40 : index
    %c32_55 = arith.constant 32 : index
    %173 = vector.load %arg13[%c40_54, %c32_55] : memref<64x64xf32, #tpu.memory_space<vmem>>, vector<8x32xf32>
    tpu.vector_store %arg13[%c40_54, %c32_55], %172 {strides = array<i32>} : memref<64x64xf32, #tpu.memory_space<vmem>>, vector<8x32xf32>,
    %c24 = arith.constant 24 : index
    %c0_56 = arith.constant 0 : index
    %174 = vector.load %arg12[%c24, %c0_56] : memref<64x256xf32, #tpu.memory_space<vmem>>, vector<8x256xf32>
    %c32_57 = arith.constant 32 : index
    %c0_58 = arith.constant 0 : index
    %175 = vector.load %arg12[%c32_57, %c0_58] : memref<64x256xf32, #tpu.memory_space<vmem>>, vector<8x256xf32>
    %176 = arith.select %4, %174, %175 : vector<8x256xi1>, vector<8x256xf32>
    %cst_59 = arith.constant dense<0.000000e+00> : vector<8x256xf32>
    %177 = tpu.matmul %168, %57, %cst_59 {dimension_numbers = #tpu.dot_dimension_numbers<[1], [0], [0], [1], [0, 0, 1, 1], [], []>} : vector<8x64xf32>, vector<64x256xf32>, vector<8x256xf32> -> vector<8x256xf32>
    %178 = arith.addf %176, %177 : vector<8x256xf32>
    %179 = vector.extract_strided_slice %178 {offsets = [0, 0], sizes = [8, 64], strides = [1, 1]} : vector<8x256xf32> to vector<8x64xf32>
    %180 = arith.negf %179 : vector<8x64xf32>
    %181 = math.exp %180 : vector<8x64xf32>
    %cst_60 = arith.constant 1.000000e+00 : f32
    %182 = vector.broadcast %cst_60 : f32 to vector<8x64xf32>
    %183 = arith.addf %182, %181 : vector<8x64xf32>
    %184 = arith.divf %182, %183 : vector<8x64xf32>
    %185 = vector.extract_strided_slice %178 {offsets = [0, 64], sizes = [8, 64], strides = [1, 1]} : vector<8x256xf32> to vector<8x64xf32>
    %186 = arith.negf %185 : vector<8x64xf32>
    %187 = math.exp %186 : vector<8x64xf32>
    %cst_61 = arith.constant 1.000000e+00 : f32
    %188 = vector.broadcast %cst_61 : f32 to vector<8x64xf32>
    %189 = arith.addf %188, %187 : vector<8x64xf32>
    %190 = arith.divf %188, %189 : vector<8x64xf32>
    %191 = vector.extract_strided_slice %178 {offsets = [0, 128], sizes = [8, 64], strides = [1, 1]} : vector<8x256xf32> to vector<8x64xf32>
    %192 = math.tanh %191 : vector<8x64xf32>
    %193 = vector.extract_strided_slice %178 {offsets = [0, 192], sizes = [8, 64], strides = [1, 1]} : vector<8x256xf32> to vector<8x64xf32>
    %194 = arith.negf %193 : vector<8x64xf32>
    %195 = math.exp %194 : vector<8x64xf32>
    %cst_62 = arith.constant 1.000000e+00 : f32
    %196 = vector.broadcast %cst_62 : f32 to vector<8x64xf32>
    %197 = arith.addf %196, %195 : vector<8x64xf32>
    %198 = arith.divf %196, %197 : vector<8x64xf32>
    %199 = arith.mulf %190, %169 : vector<8x64xf32>
    %200 = arith.mulf %184, %192 : vector<8x64xf32>
    %201 = arith.addf %199, %200 : vector<8x64xf32>
    %202 = math.tanh %201 : vector<8x64xf32>
    %203 = arith.mulf %198, %202 : vector<8x64xf32>
    %204 = arith.select %28, %203, %168 : vector<8x64xi1>, vector<8x64xf32>
    %205 = arith.select %28, %201, %169 : vector<8x64xi1>, vector<8x64xf32>
    %206 = vector.extract_strided_slice %204 {offsets = [0, 0], sizes = [8, 32], strides = [1, 1]} : vector<8x64xf32> to vector<8x32xf32>
    %c24_63 = arith.constant 24 : index
    %c0_64 = arith.constant 0 : index
    %207 = vector.load %arg13[%c24_63, %c0_64] : memref<64x64xf32, #tpu.memory_space<vmem>>, vector<8x32xf32>
    tpu.vector_store %arg13[%c24_63, %c0_64], %206 {strides = array<i32>} : memref<64x64xf32, #tpu.memory_space<vmem>>, vector<8x32xf32>,
    %208 = vector.extract_strided_slice %204 {offsets = [0, 32], sizes = [8, 32], strides = [1, 1]} : vector<8x64xf32> to vector<8x32xf32>
    %c32_65 = arith.constant 32 : index
    %c32_66 = arith.constant 32 : index
    %209 = vector.load %arg13[%c32_65, %c32_66] : memref<64x64xf32, #tpu.memory_space<vmem>>, vector<8x32xf32>
    tpu.vector_store %arg13[%c32_65, %c32_66], %208 {strides = array<i32>} : memref<64x64xf32, #tpu.memory_space<vmem>>, vector<8x32xf32>,
    %c32_67 = arith.constant 32 : index
    %c0_68 = arith.constant 0 : index
    %210 = vector.load %arg12[%c32_67, %c0_68] : memref<64x256xf32, #tpu.memory_space<vmem>>, vector<8x256xf32>
    %c24_69 = arith.constant 24 : index
    %c0_70 = arith.constant 0 : index
    %211 = vector.load %arg12[%c24_69, %c0_70] : memref<64x256xf32, #tpu.memory_space<vmem>>, vector<8x256xf32>
    %212 = arith.select %4, %210, %211 : vector<8x256xi1>, vector<8x256xf32>
    %cst_71 = arith.constant dense<0.000000e+00> : vector<8x256xf32>
    %213 = tpu.matmul %204, %57, %cst_71 {dimension_numbers = #tpu.dot_dimension_numbers<[1], [0], [0], [1], [0, 0, 1, 1], [], []>} : vector<8x64xf32>, vector<64x256xf32>, vector<8x256xf32> -> vector<8x256xf32>
    %214 = arith.addf %212, %213 : vector<8x256xf32>
    %215 = vector.extract_strided_slice %214 {offsets = [0, 0], sizes = [8, 64], strides = [1, 1]} : vector<8x256xf32> to vector<8x64xf32>
    %216 = arith.negf %215 : vector<8x64xf32>
    %217 = math.exp %216 : vector<8x64xf32>
    %cst_72 = arith.constant 1.000000e+00 : f32
    %218 = vector.broadcast %cst_72 : f32 to vector<8x64xf32>
    %219 = arith.addf %218, %217 : vector<8x64xf32>
    %220 = arith.divf %218, %219 : vector<8x64xf32>
    %221 = vector.extract_strided_slice %214 {offsets = [0, 64], sizes = [8, 64], strides = [1, 1]} : vector<8x256xf32> to vector<8x64xf32>
    %222 = arith.negf %221 : vector<8x64xf32>
    %223 = math.exp %222 : vector<8x64xf32>
    %cst_73 = arith.constant 1.000000e+00 : f32
    %224 = vector.broadcast %cst_73 : f32 to vector<8x64xf32>
    %225 = arith.addf %224, %223 : vector<8x64xf32>
    %226 = arith.divf %224, %225 : vector<8x64xf32>
    %227 = vector.extract_strided_slice %214 {offsets = [0, 128], sizes = [8, 64], strides = [1, 1]} : vector<8x256xf32> to vector<8x64xf32>
    %228 = math.tanh %227 : vector<8x64xf32>
    %229 = vector.extract_strided_slice %214 {offsets = [0, 192], sizes = [8, 64], strides = [1, 1]} : vector<8x256xf32> to vector<8x64xf32>
    %230 = arith.negf %229 : vector<8x64xf32>
    %231 = math.exp %230 : vector<8x64xf32>
    %cst_74 = arith.constant 1.000000e+00 : f32
    %232 = vector.broadcast %cst_74 : f32 to vector<8x64xf32>
    %233 = arith.addf %232, %231 : vector<8x64xf32>
    %234 = arith.divf %232, %233 : vector<8x64xf32>
    %235 = arith.mulf %226, %205 : vector<8x64xf32>
    %236 = arith.mulf %220, %228 : vector<8x64xf32>
    %237 = arith.addf %235, %236 : vector<8x64xf32>
    %238 = math.tanh %237 : vector<8x64xf32>
    %239 = arith.mulf %234, %238 : vector<8x64xf32>
    %240 = arith.select %33, %239, %204 : vector<8x64xi1>, vector<8x64xf32>
    %241 = arith.select %33, %237, %205 : vector<8x64xi1>, vector<8x64xf32>
    %242 = vector.extract_strided_slice %240 {offsets = [0, 0], sizes = [8, 32], strides = [1, 1]} : vector<8x64xf32> to vector<8x32xf32>
    %c32_75 = arith.constant 32 : index
    %c0_76 = arith.constant 0 : index
    %243 = vector.load %arg13[%c32_75, %c0_76] : memref<64x64xf32, #tpu.memory_space<vmem>>, vector<8x32xf32>
    tpu.vector_store %arg13[%c32_75, %c0_76], %242 {strides = array<i32>} : memref<64x64xf32, #tpu.memory_space<vmem>>, vector<8x32xf32>,
    %244 = vector.extract_strided_slice %240 {offsets = [0, 32], sizes = [8, 32], strides = [1, 1]} : vector<8x64xf32> to vector<8x32xf32>
    %c24_77 = arith.constant 24 : index
    %c32_78 = arith.constant 32 : index
    %245 = vector.load %arg13[%c24_77, %c32_78] : memref<64x64xf32, #tpu.memory_space<vmem>>, vector<8x32xf32>
    tpu.vector_store %arg13[%c24_77, %c32_78], %244 {strides = array<i32>} : memref<64x64xf32, #tpu.memory_space<vmem>>, vector<8x32xf32>,
    %c40_79 = arith.constant 40 : index
    %c0_80 = arith.constant 0 : index
    %246 = vector.load %arg12[%c40_79, %c0_80] : memref<64x256xf32, #tpu.memory_space<vmem>>, vector<8x256xf32>
    %c16_81 = arith.constant 16 : index
    %c0_82 = arith.constant 0 : index
    %247 = vector.load %arg12[%c16_81, %c0_82] : memref<64x256xf32, #tpu.memory_space<vmem>>, vector<8x256xf32>
    %248 = arith.select %4, %246, %247 : vector<8x256xi1>, vector<8x256xf32>
    %cst_83 = arith.constant dense<0.000000e+00> : vector<8x256xf32>
    %249 = tpu.matmul %240, %57, %cst_83 {dimension_numbers = #tpu.dot_dimension_numbers<[1], [0], [0], [1], [0, 0, 1, 1], [], []>} : vector<8x64xf32>, vector<64x256xf32>, vector<8x256xf32> -> vector<8x256xf32>
    %250 = arith.addf %248, %249 : vector<8x256xf32>
    %251 = vector.extract_strided_slice %250 {offsets = [0, 0], sizes = [8, 64], strides = [1, 1]} : vector<8x256xf32> to vector<8x64xf32>
    %252 = arith.negf %251 : vector<8x64xf32>
    %253 = math.exp %252 : vector<8x64xf32>
    %cst_84 = arith.constant 1.000000e+00 : f32
    %254 = vector.broadcast %cst_84 : f32 to vector<8x64xf32>
    %255 = arith.addf %254, %253 : vector<8x64xf32>
    %256 = arith.divf %254, %255 : vector<8x64xf32>
    %257 = vector.extract_strided_slice %250 {offsets = [0, 64], sizes = [8, 64], strides = [1, 1]} : vector<8x256xf32> to vector<8x64xf32>
    %258 = arith.negf %257 : vector<8x64xf32>
    %259 = math.exp %258 : vector<8x64xf32>
    %cst_85 = arith.constant 1.000000e+00 : f32
    %260 = vector.broadcast %cst_85 : f32 to vector<8x64xf32>
    %261 = arith.addf %260, %259 : vector<8x64xf32>
    %262 = arith.divf %260, %261 : vector<8x64xf32>
    %263 = vector.extract_strided_slice %250 {offsets = [0, 128], sizes = [8, 64], strides = [1, 1]} : vector<8x256xf32> to vector<8x64xf32>
    %264 = math.tanh %263 : vector<8x64xf32>
    %265 = vector.extract_strided_slice %250 {offsets = [0, 192], sizes = [8, 64], strides = [1, 1]} : vector<8x256xf32> to vector<8x64xf32>
    %266 = arith.negf %265 : vector<8x64xf32>
    %267 = math.exp %266 : vector<8x64xf32>
    %cst_86 = arith.constant 1.000000e+00 : f32
    %268 = vector.broadcast %cst_86 : f32 to vector<8x64xf32>
    %269 = arith.addf %268, %267 : vector<8x64xf32>
    %270 = arith.divf %268, %269 : vector<8x64xf32>
    %271 = arith.mulf %262, %241 : vector<8x64xf32>
    %272 = arith.mulf %256, %264 : vector<8x64xf32>
    %273 = arith.addf %271, %272 : vector<8x64xf32>
    %274 = math.tanh %273 : vector<8x64xf32>
    %275 = arith.mulf %270, %274 : vector<8x64xf32>
    %276 = arith.select %38, %275, %240 : vector<8x64xi1>, vector<8x64xf32>
    %277 = arith.select %38, %273, %241 : vector<8x64xi1>, vector<8x64xf32>
    %278 = vector.extract_strided_slice %276 {offsets = [0, 0], sizes = [8, 32], strides = [1, 1]} : vector<8x64xf32> to vector<8x32xf32>
    %c40_87 = arith.constant 40 : index
    %c0_88 = arith.constant 0 : index
    %279 = vector.load %arg13[%c40_87, %c0_88] : memref<64x64xf32, #tpu.memory_space<vmem>>, vector<8x32xf32>
    tpu.vector_store %arg13[%c40_87, %c0_88], %278 {strides = array<i32>} : memref<64x64xf32, #tpu.memory_space<vmem>>, vector<8x32xf32>,
    %280 = vector.extract_strided_slice %276 {offsets = [0, 32], sizes = [8, 32], strides = [1, 1]} : vector<8x64xf32> to vector<8x32xf32>
    %c16_89 = arith.constant 16 : index
    %c32_90 = arith.constant 32 : index
    %281 = vector.load %arg13[%c16_89, %c32_90] : memref<64x64xf32, #tpu.memory_space<vmem>>, vector<8x32xf32>
    tpu.vector_store %arg13[%c16_89, %c32_90], %280 {strides = array<i32>} : memref<64x64xf32, #tpu.memory_space<vmem>>, vector<8x32xf32>,
    %c48_91 = arith.constant 48 : index
    %c0_92 = arith.constant 0 : index
    %282 = vector.load %arg12[%c48_91, %c0_92] : memref<64x256xf32, #tpu.memory_space<vmem>>, vector<8x256xf32>
    %c8_93 = arith.constant 8 : index
    %c0_94 = arith.constant 0 : index
    %283 = vector.load %arg12[%c8_93, %c0_94] : memref<64x256xf32, #tpu.memory_space<vmem>>, vector<8x256xf32>
    %284 = arith.select %4, %282, %283 : vector<8x256xi1>, vector<8x256xf32>
    %cst_95 = arith.constant dense<0.000000e+00> : vector<8x256xf32>
    %285 = tpu.matmul %276, %57, %cst_95 {dimension_numbers = #tpu.dot_dimension_numbers<[1], [0], [0], [1], [0, 0, 1, 1], [], []>} : vector<8x64xf32>, vector<64x256xf32>, vector<8x256xf32> -> vector<8x256xf32>
    %286 = arith.addf %284, %285 : vector<8x256xf32>
    %287 = vector.extract_strided_slice %286 {offsets = [0, 0], sizes = [8, 64], strides = [1, 1]} : vector<8x256xf32> to vector<8x64xf32>
    %288 = arith.negf %287 : vector<8x64xf32>
    %289 = math.exp %288 : vector<8x64xf32>
    %cst_96 = arith.constant 1.000000e+00 : f32
    %290 = vector.broadcast %cst_96 : f32 to vector<8x64xf32>
    %291 = arith.addf %290, %289 : vector<8x64xf32>
    %292 = arith.divf %290, %291 : vector<8x64xf32>
    %293 = vector.extract_strided_slice %286 {offsets = [0, 64], sizes = [8, 64], strides = [1, 1]} : vector<8x256xf32> to vector<8x64xf32>
    %294 = arith.negf %293 : vector<8x64xf32>
    %295 = math.exp %294 : vector<8x64xf32>
    %cst_97 = arith.constant 1.000000e+00 : f32
    %296 = vector.broadcast %cst_97 : f32 to vector<8x64xf32>
    %297 = arith.addf %296, %295 : vector<8x64xf32>
    %298 = arith.divf %296, %297 : vector<8x64xf32>
    %299 = vector.extract_strided_slice %286 {offsets = [0, 128], sizes = [8, 64], strides = [1, 1]} : vector<8x256xf32> to vector<8x64xf32>
    %300 = math.tanh %299 : vector<8x64xf32>
    %301 = vector.extract_strided_slice %286 {offsets = [0, 192], sizes = [8, 64], strides = [1, 1]} : vector<8x256xf32> to vector<8x64xf32>
    %302 = arith.negf %301 : vector<8x64xf32>
    %303 = math.exp %302 : vector<8x64xf32>
    %cst_98 = arith.constant 1.000000e+00 : f32
    %304 = vector.broadcast %cst_98 : f32 to vector<8x64xf32>
    %305 = arith.addf %304, %303 : vector<8x64xf32>
    %306 = arith.divf %304, %305 : vector<8x64xf32>
    %307 = arith.mulf %298, %277 : vector<8x64xf32>
    %308 = arith.mulf %292, %300 : vector<8x64xf32>
    %309 = arith.addf %307, %308 : vector<8x64xf32>
    %310 = math.tanh %309 : vector<8x64xf32>
    %311 = arith.mulf %306, %310 : vector<8x64xf32>
    %312 = arith.select %43, %311, %276 : vector<8x64xi1>, vector<8x64xf32>
    %313 = arith.select %43, %309, %277 : vector<8x64xi1>, vector<8x64xf32>
    %314 = vector.extract_strided_slice %312 {offsets = [0, 0], sizes = [8, 32], strides = [1, 1]} : vector<8x64xf32> to vector<8x32xf32>
    %c48_99 = arith.constant 48 : index
    %c0_100 = arith.constant 0 : index
    %315 = vector.load %arg13[%c48_99, %c0_100] : memref<64x64xf32, #tpu.memory_space<vmem>>, vector<8x32xf32>
    tpu.vector_store %arg13[%c48_99, %c0_100], %314 {strides = array<i32>} : memref<64x64xf32, #tpu.memory_space<vmem>>, vector<8x32xf32>,
    %316 = vector.extract_strided_slice %312 {offsets = [0, 32], sizes = [8, 32], strides = [1, 1]} : vector<8x64xf32> to vector<8x32xf32>
    %c8_101 = arith.constant 8 : index
    %c32_102 = arith.constant 32 : index
    %317 = vector.load %arg13[%c8_101, %c32_102] : memref<64x64xf32, #tpu.memory_space<vmem>>, vector<8x32xf32>
    tpu.vector_store %arg13[%c8_101, %c32_102], %316 {strides = array<i32>} : memref<64x64xf32, #tpu.memory_space<vmem>>, vector<8x32xf32>,
    %c56_103 = arith.constant 56 : index
    %c0_104 = arith.constant 0 : index
    %318 = vector.load %arg12[%c56_103, %c0_104] : memref<64x256xf32, #tpu.memory_space<vmem>>, vector<8x256xf32>
    %c0_105 = arith.constant 0 : index
    %c0_106 = arith.constant 0 : index
    %319 = vector.load %arg12[%c0_105, %c0_106] : memref<64x256xf32, #tpu.memory_space<vmem>>, vector<8x256xf32>
    %320 = arith.select %4, %318, %319 : vector<8x256xi1>, vector<8x256xf32>
    %cst_107 = arith.constant dense<0.000000e+00> : vector<8x256xf32>
    %321 = tpu.matmul %312, %57, %cst_107 {dimension_numbers = #tpu.dot_dimension_numbers<[1], [0], [0], [1], [0, 0, 1, 1], [], []>} : vector<8x64xf32>, vector<64x256xf32>, vector<8x256xf32> -> vector<8x256xf32>
    %322 = arith.addf %320, %321 : vector<8x256xf32>
    %323 = vector.extract_strided_slice %322 {offsets = [0, 0], sizes = [8, 64], strides = [1, 1]} : vector<8x256xf32> to vector<8x64xf32>
    %324 = arith.negf %323 : vector<8x64xf32>
    %325 = math.exp %324 : vector<8x64xf32>
    %cst_108 = arith.constant 1.000000e+00 : f32
    %326 = vector.broadcast %cst_108 : f32 to vector<8x64xf32>
    %327 = arith.addf %326, %325 : vector<8x64xf32>
    %328 = arith.divf %326, %327 : vector<8x64xf32>
    %329 = vector.extract_strided_slice %322 {offsets = [0, 64], sizes = [8, 64], strides = [1, 1]} : vector<8x256xf32> to vector<8x64xf32>
    %330 = arith.negf %329 : vector<8x64xf32>
    %331 = math.exp %330 : vector<8x64xf32>
    %cst_109 = arith.constant 1.000000e+00 : f32
    %332 = vector.broadcast %cst_109 : f32 to vector<8x64xf32>
    %333 = arith.addf %332, %331 : vector<8x64xf32>
    %334 = arith.divf %332, %333 : vector<8x64xf32>
    %335 = vector.extract_strided_slice %322 {offsets = [0, 128], sizes = [8, 64], strides = [1, 1]} : vector<8x256xf32> to vector<8x64xf32>
    %336 = math.tanh %335 : vector<8x64xf32>
    %337 = vector.extract_strided_slice %322 {offsets = [0, 192], sizes = [8, 64], strides = [1, 1]} : vector<8x256xf32> to vector<8x64xf32>
    %338 = arith.negf %337 : vector<8x64xf32>
    %339 = math.exp %338 : vector<8x64xf32>
    %cst_110 = arith.constant 1.000000e+00 : f32
    %340 = vector.broadcast %cst_110 : f32 to vector<8x64xf32>
    %341 = arith.addf %340, %339 : vector<8x64xf32>
    %342 = arith.divf %340, %341 : vector<8x64xf32>
    %343 = arith.mulf %334, %313 : vector<8x64xf32>
    %344 = arith.mulf %328, %336 : vector<8x64xf32>
    %345 = arith.addf %343, %344 : vector<8x64xf32>
    %346 = math.tanh %345 : vector<8x64xf32>
    %347 = arith.mulf %342, %346 : vector<8x64xf32>
    %348 = arith.select %48, %347, %312 : vector<8x64xi1>, vector<8x64xf32>
    %349 = vector.extract_strided_slice %348 {offsets = [0, 0], sizes = [8, 32], strides = [1, 1]} : vector<8x64xf32> to vector<8x32xf32>
    %c56_111 = arith.constant 56 : index
    %c0_112 = arith.constant 0 : index
    %350 = vector.load %arg13[%c56_111, %c0_112] : memref<64x64xf32, #tpu.memory_space<vmem>>, vector<8x32xf32>
    tpu.vector_store %arg13[%c56_111, %c0_112], %349 {strides = array<i32>} : memref<64x64xf32, #tpu.memory_space<vmem>>, vector<8x32xf32>,
    %351 = vector.extract_strided_slice %348 {offsets = [0, 32], sizes = [8, 32], strides = [1, 1]} : vector<8x64xf32> to vector<8x32xf32>
    %c0_113 = arith.constant 0 : index
    %c32_114 = arith.constant 32 : index
    %352 = vector.load %arg13[%c0_113, %c32_114] : memref<64x64xf32, #tpu.memory_space<vmem>>, vector<8x32xf32>
    tpu.vector_store %arg13[%c0_113, %c32_114], %351 {strides = array<i32>} : memref<64x64xf32, #tpu.memory_space<vmem>>, vector<8x32xf32>,
    %c0_115 = arith.constant 0 : index
    %c0_116 = arith.constant 0 : index
    %353 = vector.load %arg8[%c0_115, %c0_116] : memref<64x256xf32, #tpu.memory_space<vmem>>, vector<64x256xf32>
    %c0_117 = arith.constant 0 : index
    %c0_118 = arith.constant 0 : index
    %354 = vector.load %arg13[%c0_117, %c0_118] : memref<64x64xf32, #tpu.memory_space<vmem>>, vector<64x64xf32>
    %c0_119 = arith.constant 0 : index
    %c0_120 = arith.constant 0 : index
    %355 = vector.load %arg6[%c0_119, %c0_120] : memref<64x256xf32, #tpu.memory_space<vmem>>, vector<64x256xf32>
    %cst_121 = arith.constant dense<0.000000e+00> : vector<64x256xf32>
    %356 = tpu.matmul %354, %355, %cst_121 {dimension_numbers = #tpu.dot_dimension_numbers<[1], [0], [0], [1], [0, 0, 1, 1], [], []>} : vector<64x64xf32>, vector<64x256xf32>, vector<64x256xf32> -> vector<64x256xf32>
    %c0_122 = arith.constant 0 : index
    %c0_123 = arith.constant 0 : index
    %357 = vector.load %arg7[%c0_122, %c0_123] : memref<1x256xf32, #tpu.memory_space<vmem>>, vector<1x256xf32>
    %358 = vector.broadcast %357 : vector<1x256xf32> to vector<64x256xf32>
    %359 = arith.addf %356, %358 : vector<64x256xf32>
    %c0_124 = arith.constant 0 : index
    %c0_125 = arith.constant 0 : index
    %360 = vector.load %arg12[%c0_124, %c0_125] : memref<64x256xf32, #tpu.memory_space<vmem>>, vector<64x256xf32>
    tpu.vector_store %arg12[%c0_124, %c0_125], %359 {strides = array<i32>} : memref<64x256xf32, #tpu.memory_space<vmem>>, vector<64x256xf32>,
    %cst_126 = arith.constant 0.000000e+00 : f32
    %361 = vector.broadcast %cst_126 : f32 to vector<8x64xf32>
    %cst_127 = arith.constant 0.000000e+00 : f32
    %362 = vector.broadcast %cst_127 : f32 to vector<8x64xf32>
    %c0_128 = arith.constant 0 : index
    %c0_129 = arith.constant 0 : index
    %363 = vector.load %arg12[%c0_128, %c0_129] : memref<64x256xf32, #tpu.memory_space<vmem>>, vector<8x256xf32>
    %c56_130 = arith.constant 56 : index
    %c0_131 = arith.constant 0 : index
    %364 = vector.load %arg12[%c56_130, %c0_131] : memref<64x256xf32, #tpu.memory_space<vmem>>, vector<8x256xf32>
    %365 = arith.select %4, %363, %364 : vector<8x256xi1>, vector<8x256xf32>
    %cst_132 = arith.constant dense<0.000000e+00> : vector<8x256xf32>
    %366 = tpu.matmul %361, %353, %cst_132 {dimension_numbers = #tpu.dot_dimension_numbers<[1], [0], [0], [1], [0, 0, 1, 1], [], []>} : vector<8x64xf32>, vector<64x256xf32>, vector<8x256xf32> -> vector<8x256xf32>
    %367 = arith.addf %365, %366 : vector<8x256xf32>
    %368 = vector.extract_strided_slice %367 {offsets = [0, 0], sizes = [8, 64], strides = [1, 1]} : vector<8x256xf32> to vector<8x64xf32>
    %369 = arith.negf %368 : vector<8x64xf32>
    %370 = math.exp %369 : vector<8x64xf32>
    %cst_133 = arith.constant 1.000000e+00 : f32
    %371 = vector.broadcast %cst_133 : f32 to vector<8x64xf32>
    %372 = arith.addf %371, %370 : vector<8x64xf32>
    %373 = arith.divf %371, %372 : vector<8x64xf32>
    %374 = vector.extract_strided_slice %367 {offsets = [0, 64], sizes = [8, 64], strides = [1, 1]} : vector<8x256xf32> to vector<8x64xf32>
    %375 = arith.negf %374 : vector<8x64xf32>
    %376 = math.exp %375 : vector<8x64xf32>
    %cst_134 = arith.constant 1.000000e+00 : f32
    %377 = vector.broadcast %cst_134 : f32 to vector<8x64xf32>
    %378 = arith.addf %377, %376 : vector<8x64xf32>
    %379 = arith.divf %377, %378 : vector<8x64xf32>
    %380 = vector.extract_strided_slice %367 {offsets = [0, 128], sizes = [8, 64], strides = [1, 1]} : vector<8x256xf32> to vector<8x64xf32>
    %381 = math.tanh %380 : vector<8x64xf32>
    %382 = vector.extract_strided_slice %367 {offsets = [0, 192], sizes = [8, 64], strides = [1, 1]} : vector<8x256xf32> to vector<8x64xf32>
    %383 = arith.negf %382 : vector<8x64xf32>
    %384 = math.exp %383 : vector<8x64xf32>
    %cst_135 = arith.constant 1.000000e+00 : f32
    %385 = vector.broadcast %cst_135 : f32 to vector<8x64xf32>
    %386 = arith.addf %385, %384 : vector<8x64xf32>
    %387 = arith.divf %385, %386 : vector<8x64xf32>
    %388 = arith.mulf %379, %362 : vector<8x64xf32>
    %389 = arith.mulf %373, %381 : vector<8x64xf32>
    %390 = arith.addf %388, %389 : vector<8x64xf32>
    %391 = math.tanh %390 : vector<8x64xf32>
    %392 = arith.mulf %387, %391 : vector<8x64xf32>
    %393 = arith.select %13, %392, %361 : vector<8x64xi1>, vector<8x64xf32>
    %394 = arith.select %13, %390, %362 : vector<8x64xi1>, vector<8x64xf32>
    %c8_136 = arith.constant 8 : index
    %c0_137 = arith.constant 0 : index
    %395 = vector.load %arg12[%c8_136, %c0_137] : memref<64x256xf32, #tpu.memory_space<vmem>>, vector<8x256xf32>
    %c48_138 = arith.constant 48 : index
    %c0_139 = arith.constant 0 : index
    %396 = vector.load %arg12[%c48_138, %c0_139] : memref<64x256xf32, #tpu.memory_space<vmem>>, vector<8x256xf32>
    %397 = arith.select %4, %395, %396 : vector<8x256xi1>, vector<8x256xf32>
    %cst_140 = arith.constant dense<0.000000e+00> : vector<8x256xf32>
    %398 = tpu.matmul %393, %353, %cst_140 {dimension_numbers = #tpu.dot_dimension_numbers<[1], [0], [0], [1], [0, 0, 1, 1], [], []>} : vector<8x64xf32>, vector<64x256xf32>, vector<8x256xf32> -> vector<8x256xf32>
    %399 = arith.addf %397, %398 : vector<8x256xf32>
    %400 = vector.extract_strided_slice %399 {offsets = [0, 0], sizes = [8, 64], strides = [1, 1]} : vector<8x256xf32> to vector<8x64xf32>
    %401 = arith.negf %400 : vector<8x64xf32>
    %402 = math.exp %401 : vector<8x64xf32>
    %cst_141 = arith.constant 1.000000e+00 : f32
    %403 = vector.broadcast %cst_141 : f32 to vector<8x64xf32>
    %404 = arith.addf %403, %402 : vector<8x64xf32>
    %405 = arith.divf %403, %404 : vector<8x64xf32>
    %406 = vector.extract_strided_slice %399 {offsets = [0, 64], sizes = [8, 64], strides = [1, 1]} : vector<8x256xf32> to vector<8x64xf32>
    %407 = arith.negf %406 : vector<8x64xf32>
    %408 = math.exp %407 : vector<8x64xf32>
    %cst_142 = arith.constant 1.000000e+00 : f32
    %409 = vector.broadcast %cst_142 : f32 to vector<8x64xf32>
    %410 = arith.addf %409, %408 : vector<8x64xf32>
    %411 = arith.divf %409, %410 : vector<8x64xf32>
    %412 = vector.extract_strided_slice %399 {offsets = [0, 128], sizes = [8, 64], strides = [1, 1]} : vector<8x256xf32> to vector<8x64xf32>
    %413 = math.tanh %412 : vector<8x64xf32>
    %414 = vector.extract_strided_slice %399 {offsets = [0, 192], sizes = [8, 64], strides = [1, 1]} : vector<8x256xf32> to vector<8x64xf32>
    %415 = arith.negf %414 : vector<8x64xf32>
    %416 = math.exp %415 : vector<8x64xf32>
    %cst_143 = arith.constant 1.000000e+00 : f32
    %417 = vector.broadcast %cst_143 : f32 to vector<8x64xf32>
    %418 = arith.addf %417, %416 : vector<8x64xf32>
    %419 = arith.divf %417, %418 : vector<8x64xf32>
    %420 = arith.mulf %411, %394 : vector<8x64xf32>
    %421 = arith.mulf %405, %413 : vector<8x64xf32>
    %422 = arith.addf %420, %421 : vector<8x64xf32>
    %423 = math.tanh %422 : vector<8x64xf32>
    %424 = arith.mulf %419, %423 : vector<8x64xf32>
    %425 = arith.select %18, %424, %393 : vector<8x64xi1>, vector<8x64xf32>
    %426 = arith.select %18, %422, %394 : vector<8x64xi1>, vector<8x64xf32>
    %c16_144 = arith.constant 16 : index
    %c0_145 = arith.constant 0 : index
    %427 = vector.load %arg12[%c16_144, %c0_145] : memref<64x256xf32, #tpu.memory_space<vmem>>, vector<8x256xf32>
    %c40_146 = arith.constant 40 : index
    %c0_147 = arith.constant 0 : index
    %428 = vector.load %arg12[%c40_146, %c0_147] : memref<64x256xf32, #tpu.memory_space<vmem>>, vector<8x256xf32>
    %429 = arith.select %4, %427, %428 : vector<8x256xi1>, vector<8x256xf32>
    %cst_148 = arith.constant dense<0.000000e+00> : vector<8x256xf32>
    %430 = tpu.matmul %425, %353, %cst_148 {dimension_numbers = #tpu.dot_dimension_numbers<[1], [0], [0], [1], [0, 0, 1, 1], [], []>} : vector<8x64xf32>, vector<64x256xf32>, vector<8x256xf32> -> vector<8x256xf32>
    %431 = arith.addf %429, %430 : vector<8x256xf32>
    %432 = vector.extract_strided_slice %431 {offsets = [0, 0], sizes = [8, 64], strides = [1, 1]} : vector<8x256xf32> to vector<8x64xf32>
    %433 = arith.negf %432 : vector<8x64xf32>
    %434 = math.exp %433 : vector<8x64xf32>
    %cst_149 = arith.constant 1.000000e+00 : f32
    %435 = vector.broadcast %cst_149 : f32 to vector<8x64xf32>
    %436 = arith.addf %435, %434 : vector<8x64xf32>
    %437 = arith.divf %435, %436 : vector<8x64xf32>
    %438 = vector.extract_strided_slice %431 {offsets = [0, 64], sizes = [8, 64], strides = [1, 1]} : vector<8x256xf32> to vector<8x64xf32>
    %439 = arith.negf %438 : vector<8x64xf32>
    %440 = math.exp %439 : vector<8x64xf32>
    %cst_150 = arith.constant 1.000000e+00 : f32
    %441 = vector.broadcast %cst_150 : f32 to vector<8x64xf32>
    %442 = arith.addf %441, %440 : vector<8x64xf32>
    %443 = arith.divf %441, %442 : vector<8x64xf32>
    %444 = vector.extract_strided_slice %431 {offsets = [0, 128], sizes = [8, 64], strides = [1, 1]} : vector<8x256xf32> to vector<8x64xf32>
    %445 = math.tanh %444 : vector<8x64xf32>
    %446 = vector.extract_strided_slice %431 {offsets = [0, 192], sizes = [8, 64], strides = [1, 1]} : vector<8x256xf32> to vector<8x64xf32>
    %447 = arith.negf %446 : vector<8x64xf32>
    %448 = math.exp %447 : vector<8x64xf32>
    %cst_151 = arith.constant 1.000000e+00 : f32
    %449 = vector.broadcast %cst_151 : f32 to vector<8x64xf32>
    %450 = arith.addf %449, %448 : vector<8x64xf32>
    %451 = arith.divf %449, %450 : vector<8x64xf32>
    %452 = arith.mulf %443, %426 : vector<8x64xf32>
    %453 = arith.mulf %437, %445 : vector<8x64xf32>
    %454 = arith.addf %452, %453 : vector<8x64xf32>
    %455 = math.tanh %454 : vector<8x64xf32>
    %456 = arith.mulf %451, %455 : vector<8x64xf32>
    %457 = arith.select %23, %456, %425 : vector<8x64xi1>, vector<8x64xf32>
    %458 = arith.select %23, %454, %426 : vector<8x64xi1>, vector<8x64xf32>
    %c24_152 = arith.constant 24 : index
    %c0_153 = arith.constant 0 : index
    %459 = vector.load %arg12[%c24_152, %c0_153] : memref<64x256xf32, #tpu.memory_space<vmem>>, vector<8x256xf32>
    %c32_154 = arith.constant 32 : index
    %c0_155 = arith.constant 0 : index
    %460 = vector.load %arg12[%c32_154, %c0_155] : memref<64x256xf32, #tpu.memory_space<vmem>>, vector<8x256xf32>
    %461 = arith.select %4, %459, %460 : vector<8x256xi1>, vector<8x256xf32>
    %cst_156 = arith.constant dense<0.000000e+00> : vector<8x256xf32>
    %462 = tpu.matmul %457, %353, %cst_156 {dimension_numbers = #tpu.dot_dimension_numbers<[1], [0], [0], [1], [0, 0, 1, 1], [], []>} : vector<8x64xf32>, vector<64x256xf32>, vector<8x256xf32> -> vector<8x256xf32>
    %463 = arith.addf %461, %462 : vector<8x256xf32>
    %464 = vector.extract_strided_slice %463 {offsets = [0, 0], sizes = [8, 64], strides = [1, 1]} : vector<8x256xf32> to vector<8x64xf32>
    %465 = arith.negf %464 : vector<8x64xf32>
    %466 = math.exp %465 : vector<8x64xf32>
    %cst_157 = arith.constant 1.000000e+00 : f32
    %467 = vector.broadcast %cst_157 : f32 to vector<8x64xf32>
    %468 = arith.addf %467, %466 : vector<8x64xf32>
    %469 = arith.divf %467, %468 : vector<8x64xf32>
    %470 = vector.extract_strided_slice %463 {offsets = [0, 64], sizes = [8, 64], strides = [1, 1]} : vector<8x256xf32> to vector<8x64xf32>
    %471 = arith.negf %470 : vector<8x64xf32>
    %472 = math.exp %471 : vector<8x64xf32>
    %cst_158 = arith.constant 1.000000e+00 : f32
    %473 = vector.broadcast %cst_158 : f32 to vector<8x64xf32>
    %474 = arith.addf %473, %472 : vector<8x64xf32>
    %475 = arith.divf %473, %474 : vector<8x64xf32>
    %476 = vector.extract_strided_slice %463 {offsets = [0, 128], sizes = [8, 64], strides = [1, 1]} : vector<8x256xf32> to vector<8x64xf32>
    %477 = math.tanh %476 : vector<8x64xf32>
    %478 = vector.extract_strided_slice %463 {offsets = [0, 192], sizes = [8, 64], strides = [1, 1]} : vector<8x256xf32> to vector<8x64xf32>
    %479 = arith.negf %478 : vector<8x64xf32>
    %480 = math.exp %479 : vector<8x64xf32>
    %cst_159 = arith.constant 1.000000e+00 : f32
    %481 = vector.broadcast %cst_159 : f32 to vector<8x64xf32>
    %482 = arith.addf %481, %480 : vector<8x64xf32>
    %483 = arith.divf %481, %482 : vector<8x64xf32>
    %484 = arith.mulf %475, %458 : vector<8x64xf32>
    %485 = arith.mulf %469, %477 : vector<8x64xf32>
    %486 = arith.addf %484, %485 : vector<8x64xf32>
    %487 = math.tanh %486 : vector<8x64xf32>
    %488 = arith.mulf %483, %487 : vector<8x64xf32>
    %489 = arith.select %28, %488, %457 : vector<8x64xi1>, vector<8x64xf32>
    %490 = arith.select %28, %486, %458 : vector<8x64xi1>, vector<8x64xf32>
    %c32_160 = arith.constant 32 : index
    %c0_161 = arith.constant 0 : index
    %491 = vector.load %arg12[%c32_160, %c0_161] : memref<64x256xf32, #tpu.memory_space<vmem>>, vector<8x256xf32>
    %c24_162 = arith.constant 24 : index
    %c0_163 = arith.constant 0 : index
    %492 = vector.load %arg12[%c24_162, %c0_163] : memref<64x256xf32, #tpu.memory_space<vmem>>, vector<8x256xf32>
    %493 = arith.select %4, %491, %492 : vector<8x256xi1>, vector<8x256xf32>
    %cst_164 = arith.constant dense<0.000000e+00> : vector<8x256xf32>
    %494 = tpu.matmul %489, %353, %cst_164 {dimension_numbers = #tpu.dot_dimension_numbers<[1], [0], [0], [1], [0, 0, 1, 1], [], []>} : vector<8x64xf32>, vector<64x256xf32>, vector<8x256xf32> -> vector<8x256xf32>
    %495 = arith.addf %493, %494 : vector<8x256xf32>
    %496 = vector.extract_strided_slice %495 {offsets = [0, 0], sizes = [8, 64], strides = [1, 1]} : vector<8x256xf32> to vector<8x64xf32>
    %497 = arith.negf %496 : vector<8x64xf32>
    %498 = math.exp %497 : vector<8x64xf32>
    %cst_165 = arith.constant 1.000000e+00 : f32
    %499 = vector.broadcast %cst_165 : f32 to vector<8x64xf32>
    %500 = arith.addf %499, %498 : vector<8x64xf32>
    %501 = arith.divf %499, %500 : vector<8x64xf32>
    %502 = vector.extract_strided_slice %495 {offsets = [0, 64], sizes = [8, 64], strides = [1, 1]} : vector<8x256xf32> to vector<8x64xf32>
    %503 = arith.negf %502 : vector<8x64xf32>
    %504 = math.exp %503 : vector<8x64xf32>
    %cst_166 = arith.constant 1.000000e+00 : f32
    %505 = vector.broadcast %cst_166 : f32 to vector<8x64xf32>
    %506 = arith.addf %505, %504 : vector<8x64xf32>
    %507 = arith.divf %505, %506 : vector<8x64xf32>
    %508 = vector.extract_strided_slice %495 {offsets = [0, 128], sizes = [8, 64], strides = [1, 1]} : vector<8x256xf32> to vector<8x64xf32>
    %509 = math.tanh %508 : vector<8x64xf32>
    %510 = vector.extract_strided_slice %495 {offsets = [0, 192], sizes = [8, 64], strides = [1, 1]} : vector<8x256xf32> to vector<8x64xf32>
    %511 = arith.negf %510 : vector<8x64xf32>
    %512 = math.exp %511 : vector<8x64xf32>
    %cst_167 = arith.constant 1.000000e+00 : f32
    %513 = vector.broadcast %cst_167 : f32 to vector<8x64xf32>
    %514 = arith.addf %513, %512 : vector<8x64xf32>
    %515 = arith.divf %513, %514 : vector<8x64xf32>
    %516 = arith.mulf %507, %490 : vector<8x64xf32>
    %517 = arith.mulf %501, %509 : vector<8x64xf32>
    %518 = arith.addf %516, %517 : vector<8x64xf32>
    %519 = math.tanh %518 : vector<8x64xf32>
    %520 = arith.mulf %515, %519 : vector<8x64xf32>
    %521 = arith.select %33, %520, %489 : vector<8x64xi1>, vector<8x64xf32>
    %522 = arith.select %33, %518, %490 : vector<8x64xi1>, vector<8x64xf32>
    %c40_168 = arith.constant 40 : index
    %c0_169 = arith.constant 0 : index
    %523 = vector.load %arg12[%c40_168, %c0_169] : memref<64x256xf32, #tpu.memory_space<vmem>>, vector<8x256xf32>
    %c16_170 = arith.constant 16 : index
    %c0_171 = arith.constant 0 : index
    %524 = vector.load %arg12[%c16_170, %c0_171] : memref<64x256xf32, #tpu.memory_space<vmem>>, vector<8x256xf32>
    %525 = arith.select %4, %523, %524 : vector<8x256xi1>, vector<8x256xf32>
    %cst_172 = arith.constant dense<0.000000e+00> : vector<8x256xf32>
    %526 = tpu.matmul %521, %353, %cst_172 {dimension_numbers = #tpu.dot_dimension_numbers<[1], [0], [0], [1], [0, 0, 1, 1], [], []>} : vector<8x64xf32>, vector<64x256xf32>, vector<8x256xf32> -> vector<8x256xf32>
    %527 = arith.addf %525, %526 : vector<8x256xf32>
    %528 = vector.extract_strided_slice %527 {offsets = [0, 0], sizes = [8, 64], strides = [1, 1]} : vector<8x256xf32> to vector<8x64xf32>
    %529 = arith.negf %528 : vector<8x64xf32>
    %530 = math.exp %529 : vector<8x64xf32>
    %cst_173 = arith.constant 1.000000e+00 : f32
    %531 = vector.broadcast %cst_173 : f32 to vector<8x64xf32>
    %532 = arith.addf %531, %530 : vector<8x64xf32>
    %533 = arith.divf %531, %532 : vector<8x64xf32>
    %534 = vector.extract_strided_slice %527 {offsets = [0, 64], sizes = [8, 64], strides = [1, 1]} : vector<8x256xf32> to vector<8x64xf32>
    %535 = arith.negf %534 : vector<8x64xf32>
    %536 = math.exp %535 : vector<8x64xf32>
    %cst_174 = arith.constant 1.000000e+00 : f32
    %537 = vector.broadcast %cst_174 : f32 to vector<8x64xf32>
    %538 = arith.addf %537, %536 : vector<8x64xf32>
    %539 = arith.divf %537, %538 : vector<8x64xf32>
    %540 = vector.extract_strided_slice %527 {offsets = [0, 128], sizes = [8, 64], strides = [1, 1]} : vector<8x256xf32> to vector<8x64xf32>
    %541 = math.tanh %540 : vector<8x64xf32>
    %542 = vector.extract_strided_slice %527 {offsets = [0, 192], sizes = [8, 64], strides = [1, 1]} : vector<8x256xf32> to vector<8x64xf32>
    %543 = arith.negf %542 : vector<8x64xf32>
    %544 = math.exp %543 : vector<8x64xf32>
    %cst_175 = arith.constant 1.000000e+00 : f32
    %545 = vector.broadcast %cst_175 : f32 to vector<8x64xf32>
    %546 = arith.addf %545, %544 : vector<8x64xf32>
    %547 = arith.divf %545, %546 : vector<8x64xf32>
    %548 = arith.mulf %539, %522 : vector<8x64xf32>
    %549 = arith.mulf %533, %541 : vector<8x64xf32>
    %550 = arith.addf %548, %549 : vector<8x64xf32>
    %551 = math.tanh %550 : vector<8x64xf32>
    %552 = arith.mulf %547, %551 : vector<8x64xf32>
    %553 = arith.select %38, %552, %521 : vector<8x64xi1>, vector<8x64xf32>
    %554 = arith.select %38, %550, %522 : vector<8x64xi1>, vector<8x64xf32>
    %c48_176 = arith.constant 48 : index
    %c0_177 = arith.constant 0 : index
    %555 = vector.load %arg12[%c48_176, %c0_177] : memref<64x256xf32, #tpu.memory_space<vmem>>, vector<8x256xf32>
    %c8_178 = arith.constant 8 : index
    %c0_179 = arith.constant 0 : index
    %556 = vector.load %arg12[%c8_178, %c0_179] : memref<64x256xf32, #tpu.memory_space<vmem>>, vector<8x256xf32>
    %557 = arith.select %4, %555, %556 : vector<8x256xi1>, vector<8x256xf32>
    %cst_180 = arith.constant dense<0.000000e+00> : vector<8x256xf32>
    %558 = tpu.matmul %553, %353, %cst_180 {dimension_numbers = #tpu.dot_dimension_numbers<[1], [0], [0], [1], [0, 0, 1, 1], [], []>} : vector<8x64xf32>, vector<64x256xf32>, vector<8x256xf32> -> vector<8x256xf32>
    %559 = arith.addf %557, %558 : vector<8x256xf32>
    %560 = vector.extract_strided_slice %559 {offsets = [0, 0], sizes = [8, 64], strides = [1, 1]} : vector<8x256xf32> to vector<8x64xf32>
    %561 = arith.negf %560 : vector<8x64xf32>
    %562 = math.exp %561 : vector<8x64xf32>
    %cst_181 = arith.constant 1.000000e+00 : f32
    %563 = vector.broadcast %cst_181 : f32 to vector<8x64xf32>
    %564 = arith.addf %563, %562 : vector<8x64xf32>
    %565 = arith.divf %563, %564 : vector<8x64xf32>
    %566 = vector.extract_strided_slice %559 {offsets = [0, 64], sizes = [8, 64], strides = [1, 1]} : vector<8x256xf32> to vector<8x64xf32>
    %567 = arith.negf %566 : vector<8x64xf32>
    %568 = math.exp %567 : vector<8x64xf32>
    %cst_182 = arith.constant 1.000000e+00 : f32
    %569 = vector.broadcast %cst_182 : f32 to vector<8x64xf32>
    %570 = arith.addf %569, %568 : vector<8x64xf32>
    %571 = arith.divf %569, %570 : vector<8x64xf32>
    %572 = vector.extract_strided_slice %559 {offsets = [0, 128], sizes = [8, 64], strides = [1, 1]} : vector<8x256xf32> to vector<8x64xf32>
    %573 = math.tanh %572 : vector<8x64xf32>
    %574 = vector.extract_strided_slice %559 {offsets = [0, 192], sizes = [8, 64], strides = [1, 1]} : vector<8x256xf32> to vector<8x64xf32>
    %575 = arith.negf %574 : vector<8x64xf32>
    %576 = math.exp %575 : vector<8x64xf32>
    %cst_183 = arith.constant 1.000000e+00 : f32
    %577 = vector.broadcast %cst_183 : f32 to vector<8x64xf32>
    %578 = arith.addf %577, %576 : vector<8x64xf32>
    %579 = arith.divf %577, %578 : vector<8x64xf32>
    %580 = arith.mulf %571, %554 : vector<8x64xf32>
    %581 = arith.mulf %565, %573 : vector<8x64xf32>
    %582 = arith.addf %580, %581 : vector<8x64xf32>
    %583 = math.tanh %582 : vector<8x64xf32>
    %584 = arith.mulf %579, %583 : vector<8x64xf32>
    %585 = arith.select %43, %584, %553 : vector<8x64xi1>, vector<8x64xf32>
    %586 = arith.select %43, %582, %554 : vector<8x64xi1>, vector<8x64xf32>
    %c56_184 = arith.constant 56 : index
    %c0_185 = arith.constant 0 : index
    %587 = vector.load %arg12[%c56_184, %c0_185] : memref<64x256xf32, #tpu.memory_space<vmem>>, vector<8x256xf32>
    %c0_186 = arith.constant 0 : index
    %c0_187 = arith.constant 0 : index
    %588 = vector.load %arg12[%c0_186, %c0_187] : memref<64x256xf32, #tpu.memory_space<vmem>>, vector<8x256xf32>
    %589 = arith.select %4, %587, %588 : vector<8x256xi1>, vector<8x256xf32>
    %cst_188 = arith.constant dense<0.000000e+00> : vector<8x256xf32>
    %590 = tpu.matmul %585, %353, %cst_188 {dimension_numbers = #tpu.dot_dimension_numbers<[1], [0], [0], [1], [0, 0, 1, 1], [], []>} : vector<8x64xf32>, vector<64x256xf32>, vector<8x256xf32> -> vector<8x256xf32>
    %591 = arith.addf %589, %590 : vector<8x256xf32>
    %592 = vector.extract_strided_slice %591 {offsets = [0, 0], sizes = [8, 64], strides = [1, 1]} : vector<8x256xf32> to vector<8x64xf32>
    %593 = arith.negf %592 : vector<8x64xf32>
    %594 = math.exp %593 : vector<8x64xf32>
    %cst_189 = arith.constant 1.000000e+00 : f32
    %595 = vector.broadcast %cst_189 : f32 to vector<8x64xf32>
    %596 = arith.addf %595, %594 : vector<8x64xf32>
    %597 = arith.divf %595, %596 : vector<8x64xf32>
    %598 = vector.extract_strided_slice %591 {offsets = [0, 64], sizes = [8, 64], strides = [1, 1]} : vector<8x256xf32> to vector<8x64xf32>
    %599 = arith.negf %598 : vector<8x64xf32>
    %600 = math.exp %599 : vector<8x64xf32>
    %cst_190 = arith.constant 1.000000e+00 : f32
    %601 = vector.broadcast %cst_190 : f32 to vector<8x64xf32>
    %602 = arith.addf %601, %600 : vector<8x64xf32>
    %603 = arith.divf %601, %602 : vector<8x64xf32>
    %604 = vector.extract_strided_slice %591 {offsets = [0, 128], sizes = [8, 64], strides = [1, 1]} : vector<8x256xf32> to vector<8x64xf32>
    %605 = math.tanh %604 : vector<8x64xf32>
    %606 = vector.extract_strided_slice %591 {offsets = [0, 192], sizes = [8, 64], strides = [1, 1]} : vector<8x256xf32> to vector<8x64xf32>
    %607 = arith.negf %606 : vector<8x64xf32>
    %608 = math.exp %607 : vector<8x64xf32>
    %cst_191 = arith.constant 1.000000e+00 : f32
    %609 = vector.broadcast %cst_191 : f32 to vector<8x64xf32>
    %610 = arith.addf %609, %608 : vector<8x64xf32>
    %611 = arith.divf %609, %610 : vector<8x64xf32>
    %612 = arith.mulf %603, %586 : vector<8x64xf32>
    %613 = arith.mulf %597, %605 : vector<8x64xf32>
    %614 = arith.addf %612, %613 : vector<8x64xf32>
    %615 = math.tanh %614 : vector<8x64xf32>
    %616 = arith.mulf %611, %615 : vector<8x64xf32>
    %617 = arith.select %48, %616, %585 : vector<8x64xi1>, vector<8x64xf32>
    %c0_192 = arith.constant 0 : index
    %c0_193 = arith.constant 0 : index
    %618 = vector.load %arg9[%c0_192, %c0_193] : memref<64x4xf32, #tpu.memory_space<vmem>>, vector<64x4xf32>
    %cst_194 = arith.constant dense<0.000000e+00> : vector<8x4xf32>
    %619 = tpu.matmul %617, %618, %cst_194 {dimension_numbers = #tpu.dot_dimension_numbers<[1], [0], [0], [1], [0, 0, 1, 1], [], []>} : vector<8x64xf32>, vector<64x4xf32>, vector<8x4xf32> -> vector<8x4xf32>
    %c0_195 = arith.constant 0 : index
    %c0_196 = arith.constant 0 : index
    %620 = vector.load %arg10[%c0_195, %c0_196] : memref<1x4xf32, #tpu.memory_space<vmem>>, vector<1x4xf32>
    %621 = vector.broadcast %620 : vector<1x4xf32> to vector<8x4xf32>
    %622 = arith.addf %619, %621 : vector<8x4xf32>
    %c0_197 = arith.constant 0 : index
    %c0_198 = arith.constant 0 : index
    %623 = vector.load %arg11[%c0_197, %c0_198] : memref<8x4xf32, #tpu.memory_space<vmem>>, vector<8x4xf32>
    tpu.vector_store %arg11[%c0_197, %c0_198], %622 {strides = array<i32>} : memref<8x4xf32, #tpu.memory_space<vmem>>, vector<8x4xf32>,
    return
  }
}

</mosaic_0001>

<bundles_post_ra>
// kernel: model_forward.1
= control target key start
LH: loop header
LB: loop body
LE: loop exit
PB: predicated region body
PF: predicated region fallthrough
CT: control target
= control target key end

     0   :  { %16 = vsyncpa [#allocation5], 0  ;;  %s3350_s17 = smov [#allocation4]   ;;  %s4474_s0 = inlined_call_operand.vmem [shape: s32[64,1], index: 0, kind: input, shape index: {}]   ;;  %s4475_s1 = inlined_call_operand.vmem [shape: s32[8,1], index: 1, kind: input, shape index: {}]   ;;  %s4476_s2 = inlined_call_operand.vmem [shape: f32[128,32], index: 2, kind: input, shape index: {}]   ;;  %s4477_s3 = inlined_call_operand.vmem [shape: f32[32,256], index: 3, kind: input, shape index: {}]   ;;  %s4478_s4 = inlined_call_operand.vmem [shape: f32[1,256], index: 4, kind: input, shape index: {}]   ;;  %s4479_s5 = inlined_call_operand.vmem [shape: f32[64,256], index: 5, kind: input, shape index: {}]   ;;  %s4480_s6 = inlined_call_operand.vmem [shape: f32[64,256], index: 6, kind: input, shape index: {}]   ;;  %s4481_s7 = inlined_call_operand.vmem [shape: f32[1,256], index: 7, kind: input, shape index: {}]   ;;  %s4482_s8 = inlined_call_operand.hbm [shape: f32[64,256], index: 8, kind: input, shape index: {}]   ;;  %s4483_s9 = inlined_call_operand.vmem [shape: f32[64,4], index: 9, kind: input, shape index: {}]   ;;  %s4484_s10 = inlined_call_operand.vmem [shape: f32[1,4], index: 10, kind: input, shape index: {}]   ;;  %s4485_s11 = inlined_call_operand.vmem [shape: f32[8,4], index: 11, kind: output, shape index: {}]  }
   0x1   :  { %s38_s18 = sshll.u32 %s3350_s17, 4  ;;  %s3326_s21 = scalar_lea.hbm %s4482_s8, 2048  ;;  %s39_s18 = int_to_ptr.vmem [resolvable:$true] %s38_s18 }
   0x2   :  { %p3327_p0 = scmp.ne.s32.totalorder %s4482_s8, %s3326_s21  ;;  %p3330_p1 = scmp.lt.u32.totalorder %s3326_s21, %s4482_s8 }
   0x4   :  { %p3332_p2 = pnand %p3330_p1, %p3327_p0 }
   0x6   :  { %3335 = shalt.err (!%p3332_p2)
}
   0x7   :  { %s3336_s26 = scalar_lea.vmem %s39_s18, 2048  ;;  %p3341_p4 = scmp.lt.s32.totalorder %s39_s18, %s39_s18 }
   0x8   :  { %p3337_p3 = scmp.ne.s32.totalorder %s39_s18, %s3336_s26  ;;  %p3342_p5 = scmp.lt.s32.totalorder %s3336_s26, %s3336_s26 }
   0xa   :  { %p3343_p6 = por %p3342_p5, %p3341_p4 }
   0xc   :  { %p3344_p7 = pnand %p3343_p6, %p3337_p3 }
   0xe   :  { %3347 = shalt.err (!%p3344_p7)
}
   0xf   :  { %s3351_s27 = smov 256   ;;  %s3352_s28 = smov 16  }
  0x10   :  { %44 = dma.hbm_to_vmem [thread:$0]  %s4482_s8, 2048, %s39_s18, [#allocation5], %s3351_s27, %s3351_s27, %s3352_s28  }
  0x11   :  { %3348 = dma.done.wait [#allocation5], 2048  }
  0x12   :  { %3349 = vsyncadd [#allocation5], 4294965248  ;;  %v52_v0 = vlaneseq  ;;  %v3353_v1 = vmov 0   ;;  %v82_v4 = vld [vmem:[%s4474_s0 + $0x10] sm:$0xff]  ;;  %v80_v5 = vld [vmem:[%s4474_s0] sm:$0xff]  ;;  %v3354_v51 = vmov 1.0  }
  0x13   :  { %3133 = vset.pattern.permute.xlu1 %v3353_v1  ;;  %3132 = vset.pattern.permute.xlu0 %v3353_v1  ;;  %v83_v6 = vld [vmem:[%s4474_s0 + $0x18] sm:$0xff]  ;;  %v81_v7 = vld [vmem:[%s4474_s0 + $0x8] sm:$0xff]  ;;  %v136_v8 = vld [vmem:[%s4476_s2] sm:$0xff]  ;;  %v3355_v58 = vmov 0.0   ;;  %vm293_vm9 = vcmask 261120   ;;  %vm563_vm13 = vcmask 523520  }
  0x14   :  { %v3439_v2 = vand.u32 127, %v52_v0  ;;  %95 = vperm.xlu1 %3133, %v82_v4   ;;  %89 = vperm.xlu0 %3132, %v80_v5   ;;  %v137_v9 = vld [vmem:[%s4476_s2 + $0x8] sm:$0xff]  ;;  %v138_v10 = vld [vmem:[%s4476_s2 + $0x10] sm:$0xff]  ;;  %v139_v12 = vld [vmem:[%s4476_s2 + $0x18] sm:$0xff]  ;;  %vm453_vm14 = vcmask 523264  }
  0x15   :  { %v2792_v11 = vpack.c.bf16 %v137_v9, %v136_v8  ;;  %v2796_v13 = vpack.c.bf16 %v139_v12, %v138_v10  ;;  %v140_v14 = vld [vmem:[%s4476_s2 + $0x20] sm:$0xff]  ;;  %v141_v15 = vld [vmem:[%s4476_s2 + $0x28] sm:$0xff]  ;;  %v142_v19 = vld [vmem:[%s4476_s2 + $0x30] sm:$0xff]  ;;  %382 = vmatprep.mubr.f32.mxu1 %v3355_v58 }
  0x16   :  { %vm59_vm0 = vcmp.lt.s32.totalorder %v3439_v2, 32  ;;  %v85_v16 = vld [vmem:[%s4474_s0 + $0x28] sm:$0xff]  ;;  %v84_v17 = vld [vmem:[%s4474_s0 + $0x20] sm:$0xff]  ;;  %v2800_v18 = vpack.c.bf16 %v141_v15, %v140_v14  ;;  %v143_v20 = vld [vmem:[%s4476_s2 + $0x38] sm:$0xff] }
  0x17   :  { %v3444_v3 = vsel %vm59_vm0, 7, %v3353_v1  ;;  %2793 = vmatprep.subr.bf16.mxu0 %v2792_v11  ;;  %v87_v21 = vld [vmem:[%s4474_s0 + $0x38] sm:$0xff]  ;;  %v86_v22 = vld [vmem:[%s4474_s0 + $0x30] sm:$0xff]  ;;  %v2804_v23 = vpack.c.bf16 %v143_v20, %v142_v19  ;;  %v144_v24 = vld [vmem:[%s4476_s2 + $0x40] sm:$0xff] }
  0x18   :  { %98 = vperm.xlu1 %3133, %v83_v6   ;;  %92 = vperm.xlu0 %3132, %v81_v7   ;;  %v145_v25 = vld [vmem:[%s4476_s2 + $0x48] sm:$0xff]  ;;  %v60_v26 = vld [vmem:[%s4475_s1] sm:$0xff]  ;;  %v146_v28 = vld [vmem:[%s4476_s2 + $0x50] sm:$0xff] }
  0x19   :  { %2795 = vmatpush3.bf16.msra.mxu0 %v2792_v11  ;;  %v2808_v27 = vpack.c.bf16 %v145_v25, %v144_v24  ;;  %v147_v29 = vld [vmem:[%s4476_s2 + $0x58] sm:$0xff]  ;;  %v274_v30 = vld [vmem:[%s4477_s3 + $0x8] sm:$0xff]  ;;  %v273_v32 = vld [vmem:[%s4477_s3] sm:$0xff] }
  0x1a   :  { %2797 = vmatprep.subr.bf16.mxu0 %v2796_v13  ;;  %v276_v31 = vld [vmem:[%s4477_s3 + $0x18] sm:$0xff]  ;;  %v275_v34 = vld [vmem:[%s4477_s3 + $0x10] sm:$0xff]  ;;  %v278_v35 = vld [vmem:[%s4477_s3 + $0x28] sm:$0xff]  ;;  %v2812_v37 = vpack.c.bf16 %v147_v29, %v146_v28 }
  0x1b   :  { %v2824_v33 = vpack.c.bf16 %v276_v31, %v274_v30  ;;  %v280_v36 = vld [vmem:[%s4477_s3 + $0x38] sm:$0xff]  ;;  %v2826_v38 = vpack.c.bf16 %v275_v34, %v273_v32  ;;  %v277_v40 = vld [vmem:[%s4477_s3 + $0x20] sm:$0xff]  ;;  %v279_v41 = vld [vmem:[%s4477_s3 + $0x30] sm:$0xff]  ;;  %v3664_v30 = vshrl.u32 %v52_v0, 7 }
  0x1c   :  { %104 = vperm.xlu1 %3133, %v85_v16   ;;  %101 = vperm.xlu0 %3132, %v84_v17   ;;  %v2828_v39 = vpack.c.bf16 %v280_v36, %v278_v35  ;;  %v148_v42 = vld [vmem:[%s4476_s2 + $0x60] sm:$0xff]  ;;  %v149_v43 = vld [vmem:[%s4476_s2 + $0x68] sm:$0xff]  ;;  %v2830_v44 = vpack.c.bf16 %v279_v41, %v277_v40  ;;  %v150_v46 = vld [vmem:[%s4476_s2 + $0x70] sm:$0xff] }
  0x1d   :  { %2799 = vmatpush3.bf16.msra.mxu0 %v2796_v13  ;;  %2825 = vmatprep.subr.bf16.mxu1 %v2824_v33  ;;  %v2816_v45 = vpack.c.bf16 %v149_v43, %v148_v42  ;;  %v151_v47 = vld [vmem:[%s4476_s2 + $0x78] sm:$0xff]  ;;  %v258_v59 = vld [vmem:[%s4479_s5 + $0x8] sm:$0xff]  ;;  %v257_v62 = vld [vmem:[%s4479_s5] sm:$0xff]  ;;  %v285_v31 = vsub.s32 0, %v3664_v30  ;;  %v4486_v34 = vsub.s32 1, %v3664_v30 }
  0x1e   :  { %2801 = vmatprep.subr.bf16.mxu0 %v2800_v18  ;;  %2827 = vmatpush1.bf16.msra.mxu1 %v2826_v38  ;;  %v2820_v48 = vpack.c.bf16 %v151_v47, %v150_v46  ;;  %v260_v60 = vld [vmem:[%s4479_s5 + $0x18] sm:$0xff]  ;;  %v259_v63 = vld [vmem:[%s4479_s5 + $0x10] sm:$0xff]  ;;  %v262_v4 = vld [vmem:[%s4479_s5 + $0x28] sm:$0xff]  ;;  %v55_v47 = vand.u32 32, %v3439_v2 }
  0x1f   :  { %2829 = vmatprep.subr.bf16.mxu1 %v2828_v39  ;;  %v3561_v61 = vpack.c.bf16 %v260_v60, %v258_v59  ;;  %v3569_v1 = vpack.c.bf16 %v259_v63, %v257_v62  ;;  %v264_v5 = vld [vmem:[%s4479_s5 + $0x38] sm:$0xff]  ;;  %v261_v7 = vld [vmem:[%s4479_s5 + $0x20] sm:$0xff]  ;;  %v263_v8 = vld [vmem:[%s4479_s5 + $0x30] sm:$0xff] }
  0x20   :  { %110 = vperm.xlu1 %3133, %v87_v21   ;;  %107 = vperm.xlu0 %3132, %v86_v22   ;;  %v3580_v6 = vpack.c.bf16 %v264_v5, %v262_v4  ;;  %v3588_v9 = vpack.c.bf16 %v263_v8, %v261_v7  ;;  %v266_v10 = vld [vmem:[%s4479_s5 + $0x48] sm:$0xff]  ;;  %v268_v11 = vld [vmem:[%s4479_s5 + $0x58] sm:$0xff]  ;;  %v265_v13 = vld [vmem:[%s4479_s5 + $0x40] sm:$0xff]  ;;  %vm3689_vm10 = vcmp.eq.s32.totalorder %v55_v47, 0 }
  0x21   :  { %2803 = vmatpush3.bf16.msra.mxu0 %v2800_v18  ;;  %v3598_v12 = vpack.c.bf16 %v268_v11, %v266_v10  ;;  %v267_v14 = vld [vmem:[%s4479_s5 + $0x50] sm:$0xff]  ;;  %v270_v16 = vld [vmem:[%s4479_s5 + $0x68] sm:$0xff]  ;;  %v272_v17 = vld [vmem:[%s4479_s5 + $0x78] sm:$0xff] }
  0x22   :  { %2805 = vmatprep.subr.bf16.mxu0 %v2804_v23  ;;  %2831 = vmatpush1.bf16.msra.mxu1 %v2830_v44  ;;  %v3607_v15 = vpack.c.bf16 %v267_v14, %v265_v13  ;;  %v3616_v18 = vpack.c.bf16 %v272_v17, %v270_v16  ;;  %v269_v19 = vld [vmem:[%s4479_s5 + $0x60] sm:$0xff]  ;;  %v271_v20 = vld [vmem:[%s4479_s5 + $0x70] sm:$0xff]  ;;  %v54_v44 = vadd.s32 128, %v3439_v2 }
  0x23   :  { %2833 = vmatprep.subr.bf16.mxu1 %v3561_v61  ;;  %v3625_v21 = vpack.c.bf16 %v271_v20, %v269_v19  ;;  %v281_v32 = vld [vmem:[%s4478_s4] sm:$0x3]  ;;  %s3356_s4 = smov 64  }
  0x24   :  { %63 = vperm.xlu1 %3133, %v60_v26   ;;  %v286_v36 = vrot.slane %v281_v32, %v285_v31 }
  0x25   :  { %2807 = vmatpush3.bf16.msra.mxu0 %v2804_v23 }
  0x26   :  { %2809 = vmatprep.subr.bf16.mxu0 %v2808_v27 }
  0x29   :  { %2811 = vmatpush3.bf16.msra.mxu0 %v2808_v27 }
  0x2a   :  { %2813 = vmatprep.subr.bf16.mxu0 %v2812_v37 }
  0x2d   :  { %2815 = vmatpush3.bf16.msra.mxu0 %v2812_v37  ;;  %v290_v37 = vrot.slane %v281_v32, %v4486_v34 }
  0x2e   :  { %2817 = vmatprep.subr.bf16.mxu0 %v2816_v45 }
  0x31   :  { %2819 = vmatpush3.bf16.msra.mxu0 %v2816_v45 }
  0x32   :  { %2821 = vmatprep.subr.bf16.mxu0 %v2820_v48 }
  0x35   :  { %2823 = vmatpush3.bf16.msra.mxu0 %v2820_v48 }
  0x36   :  { %2849 = vmatprep.subr.bf16.mxu0 %v3561_v61 }
  0x93   :  { %v96_v49 = vpop.permute.xlu1 %95  ;;  %v90_v50 = vpop.permute.xlu0 %89 }
  0x94   :  { %vm112_vm1 = vcmp.eq.s32.totalorder %v90_v50, %v3439_v2  ;;  %vm114_vm2 = vcmp.eq.s32.totalorder %v96_v49, %v3439_v2  ;;  %v56_v50 = vand.u32 32, %v54_v44 }
  0x95   :  { %2761 = vmatprep.mubr.msk.f32.mxu0 %vm112_vm1, %v3354_v51 }
  0x96   :  { %vm3695_vm11 = vcmp.eq.s32.totalorder %v56_v50, 0 }
  0x97   :  { %v99_v52 = vpop.permute.xlu1 %98  ;;  %v93_v53 = vpop.permute.xlu0 %92 }
  0x98   :  { %vm113_vm3 = vcmp.eq.s32.totalorder %v93_v53, %v3439_v2  ;;  %vm115_vm4 = vcmp.eq.s32.totalorder %v99_v52, %v3439_v2 }
  0x99   :  { %2762 = vmatmul.mubr.msk.f32.vlgmr.msra.gmra.mrb[0].mxu0 %vm113_vm3, %v3354_v51 }
  0x9a   :  { %2764 = vmatprep.mubr.msk.f32.mxu0 %vm114_vm2, %v3354_v51  ;;  %2851 = vmatpush1.bf16.msra.mxu0 %v3569_v1 }
  0x9b   :  { %v105_v54 = vpop.permute.xlu1 %104  ;;  %v102_v55 = vpop.permute.xlu0 %101  ;;  %2853 = vmatprep.subr.bf16.mxu0 %v3580_v6 }
  0x9c   :  { %vm116_vm5 = vcmp.eq.s32.totalorder %v102_v55, %v3439_v2  ;;  %vm117_vm6 = vcmp.eq.s32.totalorder %v105_v54, %v3439_v2 }
  0x9d   :  { %2765 = vmatmul.mubr.msk.f32.gmra.mrb[2].mxu0 %vm115_vm4, %v3354_v51 }
  0x9e   :  { %2767 = vmatprep.mubr.msk.f32.mxu0 %vm116_vm5, %v3354_v51  ;;  %2855 = vmatpush1.bf16.msra.mxu0 %v3588_v9 }
  0x9f   :  { %v108_v56 = vpop.permute.xlu0 %107  ;;  %v111_v57 = vpop.permute.xlu1 %110  ;;  %2857 = vmatprep.subr.bf16.mxu0 %v3598_v12 }
  0xa0   :  { %vm118_vm7 = vcmp.eq.s32.totalorder %v108_v56, %v3439_v2  ;;  %vm119_vm8 = vcmp.eq.s32.totalorder %v111_v57, %v3439_v2  ;;  %v2522_v56 = vld [vmem:[%s4483_s9 + $0x8] sm:$0xff] }
  0xa1   :  { %2768 = vmatmul.mubr.msk.f32.gmra.mrb[4].mxu0 %vm117_vm6, %v3354_v51  ;;  %vm3365_vm6 = vmmov 0  }
  0xa2   :  { %2770 = vmatprep.mubr.msk.f32.mxu0 %vm118_vm7, %v3354_v51  ;;  %2859 = vmatpush1.bf16.msra.mxu0 %v3607_v15  ;;  %vm2609_vm7 = vcmask 31744  }
  0xa3   :  { %2861 = vmatprep.subr.bf16.mxu0 %v3616_v18 }
  0xa5   :  { %2771 = vmatmul.mubr.msk.f32.gmra.mrb[6].mxu0 %vm119_vm8, %v3354_v51 }
  0xa6   :  { %638 = vmatprep.mubr.f32.mxu0 %v3355_v58  ;;  %2863 = vmatpush1.bf16.msra.mxu0 %v3625_v21 }
  0xa7   :  { %2881 = vmatprep.subr.bf16.mxu0 %v3561_v61 }
 0x16c   :  { %v2763_v22 = vpop.f32.mrb[0].mxu0 }
 0x16d   :  { %v218_v23 = vpop.f32.mrb[1].mxu0 }
 0x16e   :  { %2632 = vmatmul.mubr.msk.f32.vlgmr.msra.gmra.mrb[0].mxu1 %vm293_vm9, %v218_v23 }
 0x16f   :  { %2835 = vmatpush1.bf16.msra.mxu1 %v3569_v1  ;;  %388 = vmatprep.mubr.f32.mxu1 %v3355_v58 }
 0x170   :  { %v2766_v24 = vpop.f32.mrb[2].mxu0  ;;  %2837 = vmatprep.subr.bf16.mxu1 %v3580_v6 }
 0x171   :  { %v228_v25 = vpop.f32.mrb[3].mxu0 }
 0x172   :  { %2633 = vmatmul.mubr.msk.f32.gmra.mrb[2].mxu1 %vm293_vm9, %v2763_v22 }
 0x173   :  { %394 = vmatprep.mubr.f32.mxu1 %v3355_v58  ;;  %2839 = vmatpush1.bf16.msra.mxu1 %v3588_v9 }
 0x174   :  { %v2769_v26 = vpop.f32.mrb[4].mxu0  ;;  %2841 = vmatprep.subr.bf16.mxu1 %v3598_v12 }
 0x175   :  { %v238_v27 = vpop.f32.mrb[5].mxu0 }
 0x176   :  { %2634 = vmatmul.mubr.msk.f32.gmra.mrb[4].mxu1 %vm293_vm9, %v228_v25 }
 0x177   :  { %400 = vmatprep.mubr.f32.mxu1 %v3355_v58  ;;  %2843 = vmatpush1.bf16.msra.mxu1 %v3607_v15 }
 0x178   :  { %v2772_v28 = vpop.f32.mrb[6].mxu0  ;;  %2845 = vmatprep.subr.bf16.mxu1 %v3616_v18 }
 0x179   :  { %v248_v29 = vpop.f32.mrb[7].mxu0 }
 0x17a   :  { %2635 = vmatmul.mubr.msk.f32.gmra.mrb[6].mxu1 %vm293_vm9, %v2766_v24 }
 0x17b   :  { %406 = vmatprep.mubr.f32.mxu1 %v3355_v58  ;;  %2847 = vmatpush1.bf16.msra.mxu1 %v3625_v21 }
 0x17c   :  { %2865 = vmatprep.subr.bf16.mxu1 %v3561_v61 }
 0x17e   :  { %2636 = vmatmul.mubr.msk.f32.gmra.mrb[8].mxu1 %vm293_vm9, %v238_v27 }
 0x17f   :  { %412 = vmatprep.mubr.f32.mxu1 %v3355_v58 }
 0x182   :  { %2637 = vmatmul.mubr.msk.f32.gmra.mrb[10].mxu1 %vm293_vm9, %v2769_v26 }
 0x183   :  { %418 = vmatprep.mubr.f32.mxu1 %v3355_v58 }
 0x186   :  { %2638 = vmatmul.mubr.msk.f32.gmra.mrb[12].mxu1 %vm293_vm9, %v248_v29 }
 0x187   :  { %424 = vmatprep.mubr.f32.mxu1 %v3355_v58 }
 0x18a   :  { %2639 = vmatmul.mubr.msk.f32.gmra.mrb[14].mxu1 %vm293_vm9, %v2772_v28 }
 0x18b   :  { %521 = vmatprep.mubr.f32.mxu1 %v3355_v58 }
 0x18e   :  { %522 = vmatmul.mubr.f32.vlgmr.msra.gmra.mrb[16].mxu1 %v3355_v58 }
 0x18f   :  { %2867 = vmatpush1.bf16.msra.mxu1 %v3569_v1  ;;  %758 = vmatprep.mubr.f32.mxu1 %v3355_v58 }
 0x190   :  { %2869 = vmatprep.subr.bf16.mxu1 %v3580_v6 }
 0x193   :  { %2871 = vmatpush1.bf16.msra.mxu1 %v3588_v9 }
 0x194   :  { %2873 = vmatprep.subr.bf16.mxu1 %v3598_v12 }
 0x197   :  { %2875 = vmatpush1.bf16.msra.mxu1 %v3607_v15 }
 0x198   :  { %2877 = vmatprep.subr.bf16.mxu1 %v3616_v18 }
 0x19b   :  { %2879 = vmatpush1.bf16.msra.mxu1 %v3625_v21 }
 0x19c   :  { %2897 = vmatprep.subr.bf16.mxu1 %v3561_v61 }
 0x241   :  { %v384_v33 = vpop.f32.mrb[0].mxu1 }
 0x242   :  { %v386_v35 = vpop.f32.mrb[1].mxu1  ;;  %v3757_v27 = vadd.f32 %v384_v33, %v286_v36 }
 0x243   :  { %v3761_v32 = vadd.f32 %v386_v35, %v290_v37 }
 0x245   :  { %v390_v38 = vpop.f32.mrb[2].mxu1 }
 0x246   :  { %v3675_v39 = vadd.f32 %v390_v38, %v286_v36  ;;  %v392_v0 = vpop.f32.mrb[3].mxu1 }
 0x247   :  { %v3677_v40 = vadd.f32 %v392_v0, %v290_v37 }
 0x249   :  { %v396_v41 = vpop.f32.mrb[4].mxu1 }
 0x24a   :  { %v3679_v42 = vadd.f32 %v396_v41, %v286_v36  ;;  %v398_v43 = vpop.f32.mrb[5].mxu1 }
 0x24b   :  { %v3682_v45 = vadd.f32 %v398_v43, %v290_v37 }
 0x24d   :  { %v402_v46 = vpop.f32.mrb[6].mxu1 }
 0x24e   :  { %v3685_v48 = vadd.f32 %v402_v46, %v286_v36  ;;  %v404_v49 = vpop.f32.mrb[7].mxu1 }
 0x24f   :  { %v3687_v51 = vadd.f32 %v404_v49, %v290_v37 }
 0x251   :  { %v408_v52 = vpop.f32.mrb[8].mxu1 }
 0x252   :  { %v3693_v54 = vadd.f32 %v408_v52, %v286_v36  ;;  %v410_v55 = vpop.f32.mrb[9].mxu1 }
 0x253   :  { %v3699_v57 = vadd.f32 %v410_v55, %v290_v37 }
 0x254   :  { %v809_v59 = vsel %vm3689_vm10, %v3685_v48, %v3693_v54  ;;  %v929_v60 = vsel %vm3689_vm10, %v3693_v54, %v3685_v48 }
 0x255   :  { %v414_v62 = vpop.f32.mrb[10].mxu1  ;;  %v810_v63 = vsel %vm3695_vm11, %v3687_v51, %v3699_v57  ;;  %v930_v4 = vsel %vm3695_vm11, %v3699_v57, %v3687_v51 }
 0x256   :  { %v3717_v5 = vadd.f32 %v414_v62, %v286_v36  ;;  %v416_v7 = vpop.f32.mrb[11].mxu1 }
 0x257   :  { %v3719_v8 = vadd.f32 %v416_v7, %v290_v37 }
 0x258   :  { %v689_v10 = vsel %vm3689_vm10, %v3679_v42, %v3717_v5  ;;  %v1049_v11 = vsel %vm3689_vm10, %v3717_v5, %v3679_v42 }
 0x259   :  { %v420_v13 = vpop.f32.mrb[12].mxu1  ;;  %v690_v14 = vsel %vm3695_vm11, %v3682_v45, %v3719_v8  ;;  %v1050_v16 = vsel %vm3695_vm11, %v3719_v8, %v3682_v45 }
 0x25a   :  { %v3737_v17 = vadd.f32 %v420_v13, %v286_v36  ;;  %v422_v19 = vpop.f32.mrb[13].mxu1 }
 0x25b   :  { %v3739_v20 = vadd.f32 %v422_v19, %v290_v37 }
 0x25c   :  { %v569_v22 = vsel %vm3689_vm10, %v3675_v39, %v3737_v17  ;;  %v1169_v23 = vsel %vm3689_vm10, %v3737_v17, %v3675_v39 }
 0x25d   :  { %v426_v24 = vpop.f32.mrb[14].mxu1  ;;  %v570_v25 = vsel %vm3695_vm11, %v3677_v40, %v3739_v20  ;;  %v1170_v26 = vsel %vm3695_vm11, %v3739_v20, %v3677_v40 }
 0x25e   :  { %v3759_v28 = vadd.f32 %v426_v24, %v286_v36  ;;  %v428_v29 = vpop.f32.mrb[15].mxu1 }
 0x25f   :  { %v3763_v38 = vadd.f32 %v428_v29, %v290_v37 }
 0x260   :  { %v451_v0 = vsel %vm3689_vm10, %v3757_v27, %v3759_v28  ;;  %v1289_v41 = vsel %vm3689_vm10, %v3759_v28, %v3757_v27  ;;  %v1425_v27 = vld [vmem:[%s4480_s6 + $0x8] sm:$0xff]  ;;  %v1427_v28 = vld [vmem:[%s4480_s6 + $0x18] sm:$0xff] }
 0x261   :  { %v523_v43 = vpop.f32.mrb[16].mxu1  ;;  %v452_v33 = vsel %vm3695_vm11, %v3761_v32, %v3763_v38  ;;  %v1290_v35 = vsel %vm3695_vm11, %v3763_v38, %v3761_v32  ;;  %v1424_v32 = vld [vmem:[%s4480_s6] sm:$0xff]  ;;  %v2960_v38 = vpack.c.bf16 %v1427_v28, %v1425_v27  ;;  %v1410_v28 = vld [vmem:[#allocation4 + $0x50] sm:$0xff] }
 0x262   :  { %v528_v36 = vadd.f32 %v523_v43, %v451_v0  ;;  %v525_v37 = vpop.f32.mrb[17].mxu1  ;;  %v1408_v27 = vld [vmem:[#allocation4 + $0x40] sm:$0xff] }
 0x263   :  { %v529_v44 = vadd.f32 %v525_v37, %v452_v33  ;;  %v3357_v37 = vmov 7  }
 0x264   :  { %v2640_v46 = vmul.f32 -1.442695, %v528_v36  ;;  %v3784_v36 = vpop.permute.xlu1 %63 }
 0x265   :  { %v2641_v62 = vmul.f32 -1.442695, %v529_v44 }
 0x266   :  { %3134 = vpow2.f32 %v2640_v46 }
 0x267   :  { %3136 = vtanh.f32 %v529_v44  ;;  %v3788_v44 = vsel %vm59_vm0, 0, %v3357_v37 }
 0x268   :  { %vm65_vm12 = vcmp.lt.s32.totalorder %v3788_v44, %v3784_v36 }
 0x270   :  { %v3135_v47 = vpop.eup %3134 }
 0x271   :  { %v533_v49 = vadd.f32 1.0, %v3135_v47  ;;  %v3137_v50 = vpop.eup %3136 }
 0x273   :  { %3138 = vrcp.f32 %v533_v49 }
 0x274   :  { %3140 = vpow2.f32 %v2641_v62 }
 0x27d   :  { %v3139_v52 = vpop.eup %3138 }
 0x27e   :  { %v544_v55 = vmul.f32 %v3139_v52, %v3137_v50  ;;  %v3141_v7 = vpop.eup %3140  ;;  %v543_v19 = vmul.f32 0.0, %v3139_v52 }
 0x27f   :  { %v540_v13 = vadd.f32 1.0, %v3141_v7 }
 0x280   :  { %546 = vrot.lane.b32.xlu0 %v544_v55, %s3356_s4 }
 0x281   :  { %3142 = vrcp.f32 %v540_v13 }
 0x28b   :  { %v3143_v0 = vpop.eup %3142 }
 0x2f2   :  { %v547_v24 = vpop.permute.xlu0 %546 }
 0x2f3   :  { %v549_v29 = vadd.f32 %v547_v24, %v543_v19 }
 0x2f5   :  { %3144 = vtanh.f32 %v549_v29  ;;  %558 = vrot.lane.b32.xlu1 %v549_v29, %s3356_s4 }
 0x2ff   :  { %v3145_v43 = vpop.eup %3144 }
 0x300   :  { %v551_v33 = vmul.f32 %v3145_v43, %v3143_v0 }
 0x302   :  { %553 = vrot.lane.b32.xlu0 %v551_v33, %s3356_s4 }
 0x367   :  { %v559_v46 = vpop.permute.xlu1 %558 }
 0x368   :  { %v561_v47 = vsel %vm65_vm12, %v559_v46, 0.0 }
 0x369   :  { %661 = vrot.lane.b32.xlu0 %v561_v47, %s3356_s4 }
 0x374   :  { %v554_v49 = vpop.permute.xlu0 %553 }
 0x375   :  { %v556_v50 = vsel %vm65_vm12, %v554_v49, 0.0 }
 0x376   :  { %562 = vst.msk [vmem:[#allocation3] sm:$0xff] %vm293_vm9, %v556_v50  ;;  %2642 = vmatmul.mubr.msk.f32.vlgmr.msra.gmra.mrb[8].mxu0 %vm453_vm14, %v556_v50 }
 0x377   :  { %564 = vst.msk [vmem:[#allocation3 + $0x38] sm:$0xff] %vm563_vm13, %v556_v50  ;;  %2883 = vmatpush1.bf16.msra.mxu0 %v3569_v1  ;;  %878 = vmatprep.mubr.f32.mxu0 %v3355_v58 }
 0x378   :  { %2885 = vmatprep.subr.bf16.mxu0 %v3580_v6 }
 0x37b   :  { %2887 = vmatpush1.bf16.msra.mxu0 %v3588_v9 }
 0x37c   :  { %2889 = vmatprep.subr.bf16.mxu0 %v3598_v12 }
 0x37f   :  { %2891 = vmatpush1.bf16.msra.mxu0 %v3607_v15 }
 0x380   :  { %2893 = vmatprep.subr.bf16.mxu0 %v3616_v18 }
 0x383   :  { %2895 = vmatpush1.bf16.msra.mxu0 %v3625_v21 }
 0x384   :  { %2913 = vmatprep.subr.bf16.mxu0 %v3561_v61 }
 0x3db   :  { %v662_v37 = vpop.permute.xlu0 %661 }
 0x449   :  { %v640_v52 = vpop.f32.mrb[8].mxu0 }
 0x44a   :  { %v645_v55 = vadd.f32 %v640_v52, %v569_v22  ;;  %v642_v62 = vpop.f32.mrb[9].mxu0 }
 0x44b   :  { %v646_v7 = vadd.f32 %v642_v62, %v570_v25 }
 0x44c   :  { %v2643_v13 = vmul.f32 -1.442695, %v645_v55 }
 0x44d   :  { %v2644_v33 = vmul.f32 -1.442695, %v646_v7 }
 0x44e   :  { %3146 = vpow2.f32 %v2643_v13  ;;  %v3358_v13 = vmov 6  }
 0x44f   :  { %3148 = vtanh.f32 %v646_v7  ;;  %v3826_v7 = vsel %vm59_vm0, 1, %v3358_v13 }
 0x450   :  { %vm67_vm15 = vcmp.lt.s32.totalorder %v3826_v7, %v3784_v36 }
 0x458   :  { %v3147_v19 = vpop.eup %3146 }
 0x459   :  { %v650_v24 = vadd.f32 1.0, %v3147_v19  ;;  %v3149_v29 = vpop.eup %3148 }
 0x45b   :  { %3150 = vrcp.f32 %v650_v24 }
 0x45c   :  { %3152 = vpow2.f32 %v2644_v33 }
 0x465   :  { %v3151_v0 = vpop.eup %3150 }
 0x466   :  { %v665_v43 = vmul.f32 %v3151_v0, %v3149_v29  ;;  %v3153_v22 = vpop.eup %3152  ;;  %v664_v49 = vmul.f32 %v3151_v0, %v662_v37 }
 0x467   :  { %v657_v46 = vadd.f32 1.0, %v3153_v22 }
 0x468   :  { %667 = vrot.lane.b32.xlu1 %v665_v43, %s3356_s4 }
 0x469   :  { %3154 = vrcp.f32 %v657_v46 }
 0x473   :  { %v3155_v25 = vpop.eup %3154 }
 0x4da   :  { %v668_v52 = vpop.permute.xlu1 %667 }
 0x4db   :  { %v670_v34 = vadd.f32 %v668_v52, %v664_v49 }
 0x4dd   :  { %3156 = vtanh.f32 %v670_v34  ;;  %679 = vrot.lane.b32.xlu1 %v670_v34, %s3356_s4 }
 0x4e7   :  { %v3157_v55 = vpop.eup %3156 }
 0x4e8   :  { %v672_v62 = vmul.f32 %v3157_v55, %v3155_v25 }
 0x4ea   :  { %674 = vrot.lane.b32.xlu0 %v672_v62, %s3356_s4 }
 0x54f   :  { %v680_v19 = vpop.permute.xlu1 %679 }
 0x550   :  { %v682_v24 = vsel %vm67_vm15, %v680_v19, %v561_v47 }
 0x551   :  { %781 = vrot.lane.b32.xlu0 %v682_v24, %s3356_s4 }
 0x55c   :  { %v675_v34 = vpop.permute.xlu0 %674 }
 0x55d   :  { %v677_v29 = vsel %vm67_vm15, %v675_v34, %v556_v50 }
 0x55e   :  { %683 = vst.msk [vmem:[#allocation3 + $0x8] sm:$0xff] %vm293_vm9, %v677_v29  ;;  %2645 = vmatmul.mubr.msk.f32.vlgmr.msra.gmra.mrb[18].mxu1 %vm453_vm14, %v677_v29 }
 0x55f   :  { %684 = vst.msk [vmem:[#allocation3 + $0x30] sm:$0xff] %vm563_vm13, %v677_v29  ;;  %2899 = vmatpush1.bf16.msra.mxu1 %v3569_v1  ;;  %998 = vmatprep.mubr.f32.mxu1 %v3355_v58 }
 0x560   :  { %2901 = vmatprep.subr.bf16.mxu1 %v3580_v6 }
 0x563   :  { %2903 = vmatpush1.bf16.msra.mxu1 %v3588_v9 }
 0x564   :  { %2905 = vmatprep.subr.bf16.mxu1 %v3598_v12 }
 0x567   :  { %2907 = vmatpush1.bf16.msra.mxu1 %v3607_v15 }
 0x568   :  { %2909 = vmatprep.subr.bf16.mxu1 %v3616_v18 }
 0x56b   :  { %2911 = vmatpush1.bf16.msra.mxu1 %v3625_v21 }
 0x56c   :  { %2929 = vmatprep.subr.bf16.mxu1 %v3561_v61 }
 0x5c3   :  { %v782_v55 = vpop.permute.xlu0 %781 }
 0x631   :  { %v760_v47 = vpop.f32.mrb[18].mxu1 }
 0x632   :  { %v765_v50 = vadd.f32 %v760_v47, %v689_v10  ;;  %v762_v0 = vpop.f32.mrb[19].mxu1 }
 0x633   :  { %v766_v43 = vadd.f32 %v762_v0, %v690_v14  ;;  %v3359_v0 = vmov 5  }
 0x634   :  { %v2646_v33 = vmul.f32 -1.442695, %v765_v50 }
 0x635   :  { %v2647_v25 = vmul.f32 -1.442695, %v766_v43 }
 0x636   :  { %3158 = vpow2.f32 %v2646_v33 }
 0x637   :  { %3160 = vtanh.f32 %v766_v43  ;;  %v3864_v43 = vsel %vm59_vm0, 2, %v3359_v0 }
 0x638   :  { %vm69_vm1 = vcmp.lt.s32.totalorder %v3864_v43, %v3784_v36 }
 0x640   :  { %v3159_v22 = vpop.eup %3158 }
 0x641   :  { %v770_v37 = vadd.f32 1.0, %v3159_v22  ;;  %v3161_v46 = vpop.eup %3160 }
 0x643   :  { %3162 = vrcp.f32 %v770_v37 }
 0x644   :  { %3164 = vpow2.f32 %v2647_v25 }
 0x64d   :  { %v3163_v49 = vpop.eup %3162 }
 0x64e   :  { %v785_v52 = vmul.f32 %v3163_v49, %v3161_v46  ;;  %v3165_v10 = vpop.eup %3164  ;;  %v784_v13 = vmul.f32 %v3163_v49, %v782_v55 }
 0x64f   :  { %v777_v62 = vadd.f32 1.0, %v3165_v10 }
 0x650   :  { %787 = vrot.lane.b32.xlu1 %v785_v52, %s3356_s4 }
 0x651   :  { %3166 = vrcp.f32 %v777_v62 }
 0x65b   :  { %v3167_v14 = vpop.eup %3166 }
 0x6c2   :  { %v788_v19 = vpop.permute.xlu1 %787 }
 0x6c3   :  { %v790_v34 = vadd.f32 %v788_v19, %v784_v13 }
 0x6c5   :  { %3168 = vtanh.f32 %v790_v34  ;;  %799 = vrot.lane.b32.xlu1 %v790_v34, %s3356_s4 }
 0x6cf   :  { %v3169_v47 = vpop.eup %3168 }
 0x6d0   :  { %v792_v50 = vmul.f32 %v3169_v47, %v3167_v14 }
 0x6d2   :  { %794 = vrot.lane.b32.xlu0 %v792_v50, %s3356_s4 }
 0x737   :  { %v800_v33 = vpop.permute.xlu1 %799 }
 0x738   :  { %v802_v22 = vsel %vm69_vm1, %v800_v33, %v682_v24 }
 0x739   :  { %901 = vrot.lane.b32.xlu0 %v802_v22, %s3356_s4 }
 0x744   :  { %v795_v37 = vpop.permute.xlu0 %794 }
 0x745   :  { %v797_v46 = vsel %vm69_vm1, %v795_v37, %v677_v29 }
 0x746   :  { %803 = vst.msk [vmem:[#allocation3 + $0x10] sm:$0xff] %vm293_vm9, %v797_v46  ;;  %2648 = vmatmul.mubr.msk.f32.vlgmr.msra.gmra.mrb[10].mxu0 %vm453_vm14, %v797_v46 }
 0x747   :  { %804 = vst.msk [vmem:[#allocation3 + $0x28] sm:$0xff] %vm563_vm13, %v797_v46  ;;  %2915 = vmatpush1.bf16.msra.mxu0 %v3569_v1  ;;  %1118 = vmatprep.mubr.f32.mxu0 %v3355_v58 }
 0x748   :  { %2917 = vmatprep.subr.bf16.mxu0 %v3580_v6 }
 0x74b   :  { %2919 = vmatpush1.bf16.msra.mxu0 %v3588_v9 }
 0x74c   :  { %2921 = vmatprep.subr.bf16.mxu0 %v3598_v12 }
 0x74f   :  { %2923 = vmatpush1.bf16.msra.mxu0 %v3607_v15 }
 0x750   :  { %2925 = vmatprep.subr.bf16.mxu0 %v3616_v18 }
 0x753   :  { %2927 = vmatpush1.bf16.msra.mxu0 %v3625_v21 }
 0x754   :  { %2945 = vmatprep.subr.bf16.mxu0 %v3561_v61 }
 0x7ab   :  { %v902_v34 = vpop.permute.xlu0 %901 }
 0x819   :  { %v880_v24 = vpop.f32.mrb[10].mxu0 }
 0x81a   :  { %v885_v29 = vadd.f32 %v880_v24, %v809_v59  ;;  %v882_v49 = vpop.f32.mrb[11].mxu0  ;;  %v3360_v24 = vmov 4  }
 0x81b   :  { %v886_v52 = vadd.f32 %v882_v49, %v810_v63 }
 0x81c   :  { %v2649_v25 = vmul.f32 -1.442695, %v885_v29  ;;  %v3902_v29 = vsel %vm59_vm0, 3, %v3360_v24 }
 0x81d   :  { %v2650_v19 = vmul.f32 -1.442695, %v886_v52  ;;  %vm71_vm2 = vcmp.lt.s32.totalorder %v3902_v29, %v3784_v36 }
 0x81e   :  { %3170 = vpow2.f32 %v2649_v25 }
 0x81f   :  { %3172 = vtanh.f32 %v886_v52 }
 0x828   :  { %v3171_v10 = vpop.eup %3170 }
 0x829   :  { %v890_v55 = vadd.f32 1.0, %v3171_v10  ;;  %v3173_v61 = vpop.eup %3172 }
 0x82b   :  { %3174 = vrcp.f32 %v890_v55 }
 0x82c   :  { %3176 = vpow2.f32 %v2650_v19 }
 0x835   :  { %v3175_v62 = vpop.eup %3174 }
 0x836   :  { %v905_v13 = vmul.f32 %v3175_v62, %v3173_v61  ;;  %v3177_v59 = vpop.eup %3176  ;;  %v904_v47 = vmul.f32 %v3175_v62, %v902_v34 }
 0x837   :  { %v897_v14 = vadd.f32 1.0, %v3177_v59 }
 0x838   :  { %907 = vrot.lane.b32.xlu1 %v905_v13, %s3356_s4 }
 0x839   :  { %3178 = vrcp.f32 %v897_v14 }
 0x843   :  { %v3179_v63 = vpop.eup %3178 }
 0x8aa   :  { %v908_v50 = vpop.permute.xlu1 %907 }
 0x8ab   :  { %v910_v0 = vadd.f32 %v908_v50, %v904_v47 }
 0x8ad   :  { %3180 = vtanh.f32 %v910_v0  ;;  %919 = vrot.lane.b32.xlu1 %v910_v0, %s3356_s4 }
 0x8b7   :  { %v3181_v33 = vpop.eup %3180 }
 0x8b8   :  { %v912_v37 = vmul.f32 %v3181_v33, %v3179_v63  ;;  %v3361_v33 = vmov 3  }
 0x8ba   :  { %914 = vrot.lane.b32.xlu0 %v912_v37, %s3356_s4  ;;  %v3939_v37 = vsel %vm59_vm0, 4, %v3361_v33 }
 0x8bb   :  { %vm73_vm3 = vcmp.lt.s32.totalorder %v3939_v37, %v3784_v36 }
 0x91f   :  { %v920_v49 = vpop.permute.xlu1 %919 }
 0x920   :  { %v922_v52 = vsel %vm71_vm2, %v920_v49, %v802_v22 }
 0x921   :  { %1021 = vrot.lane.b32.xlu0 %v922_v52, %s3356_s4 }
 0x92c   :  { %v915_v25 = vpop.permute.xlu0 %914 }
 0x92d   :  { %v917_v10 = vsel %vm71_vm2, %v915_v25, %v797_v46 }
 0x92e   :  { %923 = vst.msk [vmem:[#allocation3 + $0x18] sm:$0xff] %vm293_vm9, %v917_v10  ;;  %2651 = vmatmul.mubr.msk.f32.vlgmr.msra.gmra.mrb[20].mxu1 %vm453_vm14, %v917_v10 }
 0x92f   :  { %924 = vst.msk [vmem:[#allocation3 + $0x20] sm:$0xff] %vm563_vm13, %v917_v10  ;;  %2931 = vmatpush1.bf16.msra.mxu1 %v3569_v1  ;;  %1238 = vmatprep.mubr.f32.mxu1 %v3355_v58 }
 0x930   :  { %2933 = vmatprep.subr.bf16.mxu1 %v3580_v6 }
 0x933   :  { %2935 = vmatpush1.bf16.msra.mxu1 %v3588_v9 }
 0x934   :  { %2937 = vmatprep.subr.bf16.mxu1 %v3598_v12 }
 0x937   :  { %2939 = vmatpush1.bf16.msra.mxu1 %v3607_v15 }
 0x938   :  { %2941 = vmatprep.subr.bf16.mxu1 %v3616_v18 }
 0x93b   :  { %2943 = vmatpush1.bf16.msra.mxu1 %v3625_v21 }
 0x93c   :  { %2961 = vmatprep.subr.bf16.mxu1 %v2960_v38  ;;  %v1413_v38 = vld [vmem:[#allocation4 + $0x68] sm:$0xff] }
 0xa01   :  { %v1000_v22 = vpop.f32.mrb[20].mxu1 }
 0xa02   :  { %v1005_v46 = vadd.f32 %v1000_v22, %v929_v60  ;;  %v1002_v55 = vpop.f32.mrb[21].mxu1  ;;  %v1022_v60 = vpop.permute.xlu0 %1021 }
 0xa03   :  { %v1006_v61 = vadd.f32 %v1002_v55, %v930_v4 }
 0xa04   :  { %v2652_v62 = vmul.f32 -1.442695, %v1005_v46 }
 0xa05   :  { %v2653_v48 = vmul.f32 -1.442695, %v1006_v61 }
 0xa06   :  { %3182 = vpow2.f32 %v2652_v62 }
 0xa07   :  { %3184 = vtanh.f32 %v1006_v61 }
 0xa10   :  { %v3183_v13 = vpop.eup %3182 }
 0xa11   :  { %v1010_v19 = vadd.f32 1.0, %v3183_v13  ;;  %v3185_v59 = vpop.eup %3184 }
 0xa13   :  { %3186 = vrcp.f32 %v1010_v19  ;;  %v3362_v19 = vmov 2  }
 0xa14   :  { %3188 = vpow2.f32 %v2653_v48 }
 0xa1d   :  { %v3187_v34 = vpop.eup %3186 }
 0xa1e   :  { %v1025_v14 = vmul.f32 %v3187_v34, %v3185_v59  ;;  %v3189_v54 = vpop.eup %3188  ;;  %v1024_v50 = vmul.f32 %v3187_v34, %v1022_v60  ;;  %v3976_v59 = vsel %vm59_vm0, 5, %v3362_v19  ;;  %v1430_v19 = vld [vmem:[%s4480_s6 + $0x30] sm:$0xff] }
 0xa1f   :  { %v1017_v47 = vadd.f32 1.0, %v3189_v54  ;;  %vm75_vm4 = vcmp.lt.s32.totalorder %v3976_v59, %v3784_v36 }
 0xa20   :  { %1027 = vrot.lane.b32.xlu1 %v1025_v14, %s3356_s4 }
 0xa21   :  { %3190 = vrcp.f32 %v1017_v47 }
 0xa2b   :  { %v3191_v57 = vpop.eup %3190 }
 0xa92   :  { %v1028_v0 = vpop.permute.xlu1 %1027 }
 0xa93   :  { %v1030_v51 = vadd.f32 %v1028_v0, %v1024_v50 }
 0xa95   :  { %3192 = vtanh.f32 %v1030_v51  ;;  %1039 = vrot.lane.b32.xlu1 %v1030_v51, %s3356_s4 }
 0xa9f   :  { %v3193_v4 = vpop.eup %3192 }
 0xaa0   :  { %v1032_v63 = vmul.f32 %v3193_v4, %v3191_v57 }
 0xaa2   :  { %1034 = vrot.lane.b32.xlu0 %v1032_v63, %s3356_s4 }
 0xb07   :  { %v1040_v24 = vpop.permute.xlu1 %1039 }
 0xb08   :  { %v1042_v49 = vsel %vm73_vm3, %v1040_v24, %v922_v52 }
 0xb09   :  { %1141 = vrot.lane.b32.xlu0 %v1042_v49, %s3356_s4 }
 0xb14   :  { %v1035_v25 = vpop.permute.xlu0 %1034 }
 0xb15   :  { %v1037_v22 = vsel %vm73_vm3, %v1035_v25, %v917_v10 }
 0xb16   :  { %1043 = vst.msk [vmem:[#allocation3 + $0x20] sm:$0xff] %vm293_vm9, %v1037_v22  ;;  %2654 = vmatmul.mubr.msk.f32.vlgmr.msra.gmra.mrb[12].mxu0 %vm453_vm14, %v1037_v22 }
 0xb17   :  { %1044 = vst.msk [vmem:[#allocation3 + $0x18] sm:$0xff] %vm563_vm13, %v1037_v22  ;;  %2947 = vmatpush1.bf16.msra.mxu0 %v3569_v1  ;;  %1358 = vmatprep.mubr.f32.mxu0 %v3355_v58 }
 0xb18   :  { %2949 = vmatprep.subr.bf16.mxu0 %v3580_v6 }
 0xb1b   :  { %2951 = vmatpush1.bf16.msra.mxu0 %v3588_v9 }
 0xb1c   :  { %2953 = vmatprep.subr.bf16.mxu0 %v3598_v12 }
 0xb1f   :  { %2955 = vmatpush1.bf16.msra.mxu0 %v3607_v15 }
 0xb20   :  { %2957 = vmatprep.subr.bf16.mxu0 %v3616_v18 }
 0xb23   :  { %2959 = vmatpush1.bf16.msra.mxu0 %v3625_v21 }
 0xbe9   :  { %v1120_v52 = vpop.f32.mrb[12].mxu0 }
 0xbea   :  { %v1125_v1 = vadd.f32 %v1120_v52, %v1049_v11  ;;  %v1122_v10 = vpop.f32.mrb[13].mxu0  ;;  %v1142_v11 = vpop.permute.xlu0 %1141 }
 0xbeb   :  { %v1126_v6 = vadd.f32 %v1122_v10, %v1050_v16 }
 0xbec   :  { %v2655_v9 = vmul.f32 -1.442695, %v1125_v1  ;;  %v3363_v1 = vmov 1  }
 0xbed   :  { %v2656_v42 = vmul.f32 -1.442695, %v1126_v6  ;;  %v4006_v10 = vsel %vm59_vm0, 6, %v3363_v1  ;;  %v1403_v1 = vld [vmem:[#allocation4 + $0x18] sm:$0xff]  ;;  %vm79_vm0 = vcmp.lt.s32.totalorder %v3444_v3, %v3784_v36 }
 0xbee   :  { %3194 = vpow2.f32 %v2655_v9  ;;  %vm77_vm5 = vcmp.lt.s32.totalorder %v4006_v10, %v3784_v36 }
 0xbef   :  { %3196 = vtanh.f32 %v1126_v6 }
 0xbf8   :  { %v3195_v12 = vpop.eup %3194 }
 0xbf9   :  { %v1130_v15 = vadd.f32 1.0, %v3195_v12  ;;  %v3197_v18 = vpop.eup %3196 }
 0xbfb   :  { %3198 = vrcp.f32 %v1130_v15 }
 0xbfc   :  { %3200 = vpow2.f32 %v2656_v42 }
 0xc05   :  { %v3199_v21 = vpop.eup %3198 }
 0xc06   :  { %v1145_v46 = vmul.f32 %v3199_v21, %v3197_v18  ;;  %v3201_v5 = vpop.eup %3200  ;;  %v1144_v61 = vmul.f32 %v3199_v21, %v1142_v11 }
 0xc07   :  { %v1137_v55 = vadd.f32 1.0, %v3201_v5 }
 0xc08   :  { %1147 = vrot.lane.b32.xlu1 %v1145_v46, %s3356_s4 }
 0xc09   :  { %3202 = vrcp.f32 %v1137_v55 }
 0xc13   :  { %v3203_v8 = vpop.eup %3202 }
 0xc7a   :  { %v1148_v62 = vpop.permute.xlu1 %1147 }
 0xc7b   :  { %v1150_v45 = vadd.f32 %v1148_v62, %v1144_v61 }
 0xc7d   :  { %3204 = vtanh.f32 %v1150_v45  ;;  %1159 = vrot.lane.b32.xlu1 %v1150_v45, %s3356_s4  ;;  %v1431_v45 = vld [vmem:[%s4480_s6 + $0x38] sm:$0xff] }
 0xc87   :  { %v3205_v16 = vpop.eup %3204 }
 0xc88   :  { %v1152_v13 = vmul.f32 %v3205_v16, %v3203_v8 }
 0xc8a   :  { %1154 = vrot.lane.b32.xlu0 %v1152_v13, %s3356_s4  ;;  %v1428_v13 = vld [vmem:[%s4480_s6 + $0x20] sm:$0xff] }
 0xcef   :  { %v1160_v34 = vpop.permute.xlu1 %1159 }
 0xcf0   :  { %v1162_v14 = vsel %vm75_vm4, %v1160_v34, %v1042_v49  ;;  %v2966_v34 = vpack.c.bf16 %v1430_v19, %v1428_v13 }
 0xcf1   :  { %1261 = vrot.lane.b32.xlu0 %v1162_v14, %s3356_s4 }
 0xcfc   :  { %v1155_v48 = vpop.permute.xlu0 %1154 }
 0xcfd   :  { %v1157_v54 = vsel %vm75_vm4, %v1155_v48, %v1037_v22 }
 0xcfe   :  { %1163 = vst.msk [vmem:[#allocation3 + $0x28] sm:$0xff] %vm293_vm9, %v1157_v54  ;;  %2657 = vmatmul.mubr.msk.f32.vlgmr.msra.gmra.mrb[22].mxu1 %vm453_vm14, %v1157_v54 }
 0xcff   :  { %1164 = vst.msk [vmem:[#allocation3 + $0x10] sm:$0xff] %vm563_vm13, %v1157_v54  ;;  %1540 = vmatprep.mubr.f32.mxu1 %v3355_v58 }
 0xdd1   :  { %v1240_v60 = vpop.f32.mrb[22].mxu1 }
 0xdd2   :  { %v1245_v47 = vadd.f32 %v1240_v60, %v1169_v23  ;;  %v1242_v50 = vpop.f32.mrb[23].mxu1  ;;  %v1262_v23 = vpop.permute.xlu0 %1261 }
 0xdd3   :  { %v1246_v0 = vadd.f32 %v1242_v50, %v1170_v26 }
 0xdd4   :  { %v2658_v51 = vmul.f32 -1.442695, %v1245_v47 }
 0xdd5   :  { %v2659_v39 = vmul.f32 -1.442695, %v1246_v0 }
 0xdd6   :  { %3206 = vpow2.f32 %v2658_v51  ;;  %v1433_v51 = vld [vmem:[%s4480_s6 + $0x48] sm:$0xff] }
 0xdd7   :  { %3208 = vtanh.f32 %v1246_v0 }
 0xde0   :  { %v3207_v57 = vpop.eup %3206 }
 0xde1   :  { %v1250_v4 = vadd.f32 1.0, %v3207_v57  ;;  %v3209_v63 = vpop.eup %3208  ;;  %v1435_v57 = vld [vmem:[%s4480_s6 + $0x58] sm:$0xff] }
 0xde3   :  { %3210 = vrcp.f32 %v1250_v4  ;;  %v2968_v4 = vpack.c.bf16 %v1435_v57, %v1433_v51  ;;  %v1440_v57 = vld [vmem:[%s4481_s7] sm:$0x3] }
 0xde4   :  { %3212 = vpow2.f32 %v2659_v39  ;;  %v1437_v39 = vld [vmem:[%s4480_s6 + $0x68] sm:$0xff] }
 0xded   :  { %v3211_v33 = vpop.eup %3210 }
 0xdee   :  { %v1265_v24 = vmul.f32 %v3211_v33, %v3209_v63  ;;  %v3213_v17 = vpop.eup %3212  ;;  %v1264_v25 = vmul.f32 %v3211_v33, %v1262_v23  ;;  %v1432_v63 = vld [vmem:[%s4480_s6 + $0x40] sm:$0xff]  ;;  %v1434_v33 = vld [vmem:[%s4480_s6 + $0x50] sm:$0xff] }
 0xdef   :  { %v1257_v49 = vadd.f32 1.0, %v3213_v17  ;;  %v1439_v17 = vld [vmem:[%s4480_s6 + $0x78] sm:$0xff]  ;;  %v1436_v23 = vld [vmem:[%s4480_s6 + $0x60] sm:$0xff] }
 0xdf0   :  { %1267 = vrot.lane.b32.xlu1 %v1265_v24, %s3356_s4  ;;  %v2970_v24 = vpack.c.bf16 %v1434_v33, %v1432_v63  ;;  %v1445_v33 = vrot.slane %v1440_v57, %v285_v31 }
 0xdf1   :  { %3214 = vrcp.f32 %v1257_v49  ;;  %v2972_v49 = vpack.c.bf16 %v1439_v17, %v1437_v39 }
 0xdfb   :  { %v3215_v20 = vpop.eup %3214 }
 0xe62   :  { %v1268_v22 = vpop.permute.xlu1 %1267 }
 0xe63   :  { %v1270_v40 = vadd.f32 %v1268_v22, %v1264_v25  ;;  %v1438_v25 = vld [vmem:[%s4480_s6 + $0x70] sm:$0xff] }
 0xe64   :  { %v2974_v22 = vpack.c.bf16 %v1438_v25, %v1436_v23 }
 0xe65   :  { %3216 = vtanh.f32 %v1270_v40  ;;  %1279 = vrot.lane.b32.xlu1 %v1270_v40, %s3356_s4 }
 0xe6f   :  { %v3217_v26 = vpop.eup %3216 }
 0xe70   :  { %v1272_v52 = vmul.f32 %v3217_v26, %v3215_v20 }
 0xe72   :  { %1274 = vrot.lane.b32.xlu0 %v1272_v52, %s3356_s4  ;;  %v1401_v52 = vld [vmem:[#allocation4 + $0x8] sm:$0xff] }
 0xed7   :  { %v1280_v6 = vpop.permute.xlu1 %1279 }
 0xed8   :  { %v1282_v9 = vsel %vm77_vm5, %v1280_v6, %v1162_v14  ;;  %v4086_v6 = vpack.c.bf16 %v1403_v1, %v1401_v52 }
 0xed9   :  { %1381 = vrot.lane.b32.xlu0 %v1282_v9, %s3356_s4  ;;  %v1400_v9 = vld [vmem:[#allocation4] sm:$0xff] }
 0xeda   :  { %2977 = vmatprep.subr.bf16.mxu0 %v4086_v6 }
 0xee4   :  { %v1275_v12 = vpop.permute.xlu0 %1274 }
 0xee5   :  { %v4017_v15 = vsel %vm77_vm5, %v1275_v12, %v1157_v54  ;;  %v1402_v12 = vld [vmem:[#allocation4 + $0x10] sm:$0xff] }
 0xee6   :  { %1283 = vst.msk [vmem:[#allocation3 + $0x30] sm:$0xff] %vm293_vm9, %v4017_v15  ;;  %2660 = vmatmul.mubr.msk.f32.vlgmr.msra.gmra.mrb[14].mxu0 %vm453_vm14, %v4017_v15 }
 0xee7   :  { %1284 = vst.msk [vmem:[#allocation3 + $0x8] sm:$0xff] %vm563_vm13, %v4017_v15  ;;  %1675 = vmatprep.mubr.f32.mxu0 %v3355_v58 }
 0xf4b   :  { %v1382_v54 = vpop.permute.xlu0 %1381 }
 0xfb9   :  { %v1360_v2 = vpop.f32.mrb[14].mxu0 }
 0xfba   :  { %v1365_v18 = vadd.f32 %v1360_v2, %v1289_v41  ;;  %v1362_v21 = vpop.f32.mrb[15].mxu0  ;;  %v1426_v41 = vld [vmem:[%s4480_s6 + $0x10] sm:$0xff]  ;;  %v4088_v2 = vpack.c.bf16 %v1402_v12, %v1400_v9 }
 0xfbb   :  { %v1366_v46 = vadd.f32 %v1362_v21, %v1290_v35  ;;  %v1429_v35 = vld [vmem:[%s4480_s6 + $0x28] sm:$0xff]  ;;  %v2962_v8 = vpack.c.bf16 %v1426_v41, %v1424_v32  ;;  %v1407_v21 = vld [vmem:[#allocation4 + $0x38] sm:$0xff]  ;;  %v4101_v32 = vpack.c.bf16 %v1410_v28, %v1408_v27 }
 0xfbc   :  { %v2661_v42 = vmul.f32 -1.442695, %v1365_v18  ;;  %v2964_v16 = vpack.c.bf16 %v1431_v45, %v1429_v35  ;;  %2979 = vmatpush1.bf16.msra.mxu0 %v4088_v2  ;;  %v1405_v18 = vld [vmem:[#allocation4 + $0x28] sm:$0xff]  ;;  %v1415_v41 = vld [vmem:[#allocation4 + $0x78] sm:$0xff]  ;;  %v1412_v45 = vld [vmem:[#allocation4 + $0x60] sm:$0xff] }
 0xfbd   :  { %2963 = vmatpush1.bf16.msra.mxu1 %v2962_v8  ;;  %v2662_v14 = vmul.f32 -1.442695, %v1366_v46  ;;  %v4105_v35 = vpack.c.bf16 %v1415_v41, %v1413_v38  ;;  %v1414_v8 = vld [vmem:[#allocation4 + $0x70] sm:$0xff] }
 0xfbe   :  { %3218 = vpow2.f32 %v2661_v42  ;;  %2965 = vmatprep.subr.bf16.mxu1 %v2964_v16  ;;  %v1404_v42 = vld [vmem:[#allocation4 + $0x20] sm:$0xff]  ;;  %v4107_v16 = vpack.c.bf16 %v1414_v8, %v1412_v45 }
 0xfbf   :  { %3220 = vtanh.f32 %v1366_v46  ;;  %v4093_v46 = vpack.c.bf16 %v1407_v21, %v1405_v18 }
 0xfc1   :  { %2967 = vmatpush1.bf16.msra.mxu1 %v2966_v34  ;;  %2981 = vmatprep.subr.bf16.mxu0 %v4093_v46 }
 0xfc2   :  { %2969 = vmatprep.subr.bf16.mxu1 %v2968_v4 }
 0xfc5   :  { %2971 = vmatpush1.bf16.msra.mxu1 %v2970_v24  ;;  %v4491_v24 = vsub.s32 1, %v3664_v30 }
 0xfc6   :  { %2973 = vmatprep.subr.bf16.mxu1 %v2972_v49 }
 0xfc7   :  { %v1449_v39 = vrot.slane %v1440_v57, %v4491_v24 }
 0xfc8   :  { %v3219_v5 = vpop.eup %3218 }
 0xfc9   :  { %v1370_v11 = vadd.f32 1.0, %v3219_v5  ;;  %v3221_v55 = vpop.eup %3220  ;;  %2975 = vmatpush1.bf16.msra.mxu1 %v2974_v22  ;;  %v1406_v5 = vld [vmem:[#allocation4 + $0x30] sm:$0xff] }
 0xfca   :  { %3009 = vmatprep.subr.bf16.mxu1 %v4086_v6 }
 0xfcb   :  { %3222 = vrcp.f32 %v1370_v11  ;;  %v4095_v11 = vpack.c.bf16 %v1406_v5, %v1404_v42 }
 0xfcc   :  { %3224 = vpow2.f32 %v2662_v14  ;;  %v1417_v14 = vld [vmem:[#allocation3 + $0x8] sm:$0xff] }
 0xfcd   :  { %2983 = vmatpush1.bf16.msra.mxu0 %v4095_v11 }
 0xfd5   :  { %v3223_v61 = vpop.eup %3222 }
 0xfd6   :  { %v1385_v62 = vmul.f32 %v3223_v61, %v3221_v55  ;;  %v3225_v48 = vpop.eup %3224  ;;  %v1384_v47 = vmul.f32 %v3223_v61, %v1382_v54  ;;  %v1409_v55 = vld [vmem:[#allocation4 + $0x48] sm:$0xff]  ;;  %v1411_v61 = vld [vmem:[#allocation4 + $0x58] sm:$0xff]  ;;  %v1420_v54 = vld [vmem:[#allocation3 + $0x20] sm:$0xff] }
 0xfd7   :  { %v1377_v60 = vadd.f32 1.0, %v3225_v48  ;;  %v1419_v48 = vld [vmem:[#allocation3 + $0x18] sm:$0xff] }
 0xfd8   :  { %1387 = vrot.lane.b32.xlu1 %v1385_v62, %s3356_s4  ;;  %v4099_v62 = vpack.c.bf16 %v1411_v61, %v1409_v55 }
 0xfd9   :  { %3226 = vrcp.f32 %v1377_v60  ;;  %v1421_v60 = vld [vmem:[#allocation3 + $0x28] sm:$0xff] }
 0xfda   :  { %2985 = vmatprep.subr.bf16.mxu0 %v4099_v62 }
 0xfdb   :  { %2987 = vmatpush1.bf16.msra.mxu0 %v4101_v32 }
 0xfdc   :  { %2989 = vmatprep.subr.bf16.mxu0 %v4105_v35 }
 0xfdf   :  { %2991 = vmatpush1.bf16.msra.mxu0 %v4107_v16 }
 0xfe0   :  { %2993 = vmatprep.subr.bf16.mxu0 %v4086_v6 }
 0xfe2   :  { %1676 = vmatmul.mubr.f32.vlgmr.msra.gmra.mrb[16].mxu0 %v3355_v58 }
 0xfe3   :  { %v3227_v40 = vpop.eup %3226  ;;  %2995 = vmatpush1.bf16.msra.mxu0 %v4088_v2  ;;  %1789 = vmatprep.mubr.f32.mxu0 %v3355_v58 }
 0xfe4   :  { %2997 = vmatprep.subr.bf16.mxu0 %v4093_v46 }
 0xfe7   :  { %2999 = vmatpush1.bf16.msra.mxu0 %v4095_v11 }
 0xfe8   :  { %3001 = vmatprep.subr.bf16.mxu0 %v4099_v62 }
 0xfeb   :  { %3003 = vmatpush1.bf16.msra.mxu0 %v4101_v32 }
 0xfec   :  { %3005 = vmatprep.subr.bf16.mxu0 %v4105_v35 }
 0xfef   :  { %3007 = vmatpush1.bf16.msra.mxu0 %v4107_v16 }
 0xff0   :  { %3025 = vmatprep.subr.bf16.mxu0 %v4086_v6 }
0x104a   :  { %v1388_v50 = vpop.permute.xlu1 %1387 }
0x104b   :  { %v1390_v0 = vadd.f32 %v1388_v50, %v1384_v47  ;;  %v1422_v47 = vld [vmem:[#allocation3 + $0x30] sm:$0xff] }
0x104d   :  { %3228 = vtanh.f32 %v1390_v0 }
0x1057   :  { %v3229_v20 = vpop.eup %3228 }
0x1058   :  { %v1392_v26 = vmul.f32 %v3229_v20, %v3227_v40 }
0x105a   :  { %1394 = vrot.lane.b32.xlu0 %v1392_v26, %s3356_s4 }
0x10b5   :  { %v1677_v0 = vpop.f32.mrb[16].mxu0 }
0x10b6   :  { %v1679_v51 = vpop.f32.mrb[17].mxu0 }
0x10cc   :  { %v1395_v13 = vpop.permute.xlu0 %1394 }
0x10cd   :  { %v1397_v19 = vsel %vm79_vm0, %v1395_v13, %v4017_v15  ;;  %v1418_v15 = vld [vmem:[#allocation3 + $0x10] sm:$0xff] }
0x10ce   :  { %1398 = vst.msk [vmem:[#allocation3 + $0x38] sm:$0xff] %vm293_vm9, %v1397_v19 }
0x10cf   :  { %1399 = vst.msk [vmem:[#allocation3] sm:$0xff] %vm563_vm13, %v1397_v19 }
0x10d5   :  { %v1423_v50 = vld [vmem:[#allocation3 + $0x38] sm:$0xff] }
0x10d6   :  { %v1416_v34 = vld [vmem:[#allocation3] sm:$0xff] }
0x10d7   :  { %2663 = vmatmul.mubr.msk.f32.vlgmr.msra.gmra.mrb[24].mxu1 %vm453_vm14, %v1416_v34 }
0x10d8   :  { %1546 = vmatprep.mubr.f32.mxu1 %v3355_v58  ;;  %3011 = vmatpush1.bf16.msra.mxu1 %v4088_v2 }
0x10d9   :  { %3013 = vmatprep.subr.bf16.mxu1 %v4093_v46 }
0x10db   :  { %2664 = vmatmul.mubr.msk.f32.gmra.mrb[26].mxu1 %vm453_vm14, %v1417_v14 }
0x10dc   :  { %1552 = vmatprep.mubr.f32.mxu1 %v3355_v58  ;;  %3015 = vmatpush1.bf16.msra.mxu1 %v4095_v11 }
0x10dd   :  { %3017 = vmatprep.subr.bf16.mxu1 %v4099_v62 }
0x10df   :  { %2665 = vmatmul.mubr.msk.f32.gmra.mrb[28].mxu1 %vm453_vm14, %v1418_v15 }
0x10e0   :  { %1558 = vmatprep.mubr.f32.mxu1 %v3355_v58  ;;  %3019 = vmatpush1.bf16.msra.mxu1 %v4101_v32 }
0x10e1   :  { %3021 = vmatprep.subr.bf16.mxu1 %v4105_v35 }
0x10e3   :  { %2666 = vmatmul.mubr.msk.f32.gmra.mrb[30].mxu1 %vm453_vm14, %v1419_v48 }
0x10e4   :  { %1564 = vmatprep.mubr.f32.mxu1 %v3355_v58  ;;  %3023 = vmatpush1.bf16.msra.mxu1 %v4107_v16 }
0x10e5   :  { %3041 = vmatprep.subr.bf16.mxu1 %v4086_v6 }
0x10e7   :  { %2667 = vmatmul.mubr.msk.f32.gmra.mrb[32].mxu1 %vm453_vm14, %v1420_v54 }
0x10e8   :  { %1570 = vmatprep.mubr.f32.mxu1 %v3355_v58 }
0x10eb   :  { %2668 = vmatmul.mubr.msk.f32.gmra.mrb[34].mxu1 %vm453_vm14, %v1421_v60 }
0x10ec   :  { %1576 = vmatprep.mubr.f32.mxu1 %v3355_v58 }
0x10ef   :  { %2669 = vmatmul.mubr.msk.f32.gmra.mrb[36].mxu1 %vm453_vm14, %v1422_v47 }
0x10f0   :  { %1582 = vmatprep.mubr.f32.mxu1 %v3355_v58 }
0x10f3   :  { %2670 = vmatmul.mubr.msk.f32.gmra.mrb[38].mxu1 %vm453_vm14, %v1423_v50 }
0x10f4   :  { %1907 = vmatprep.mubr.f32.mxu1 %v3355_v58 }
0x11aa   :  { %v1542_v4 = vpop.f32.mrb[24].mxu1 }
0x11ab   :  { %v1544_v63 = vpop.f32.mrb[25].mxu1  ;;  %v4233_v24 = vadd.f32 %v1542_v4, %v1445_v33 }
0x11ae   :  { %v1548_v17 = vpop.f32.mrb[26].mxu1 }
0x11af   :  { %v4161_v23 = vadd.f32 %v1548_v17, %v1445_v33  ;;  %v1550_v49 = vpop.f32.mrb[27].mxu1 }
0x11b0   :  { %v4163_v25 = vadd.f32 %v1550_v49, %v1449_v39 }
0x11b2   :  { %v1554_v22 = vpop.f32.mrb[28].mxu1 }
0x11b3   :  { %v4165_v40 = vadd.f32 %v1554_v22, %v1445_v33  ;;  %v1556_v20 = vpop.f32.mrb[29].mxu1  ;;  %v4237_v22 = vadd.f32 %v1544_v63, %v1449_v39 }
0x11b4   :  { %v4167_v26 = vadd.f32 %v1556_v20, %v1449_v39 }
0x11b6   :  { %v1560_v52 = vpop.f32.mrb[30].mxu1 }
0x11b7   :  { %v4169_v1 = vadd.f32 %v1560_v52, %v1445_v33  ;;  %v1562_v9 = vpop.f32.mrb[31].mxu1 }
0x11b8   :  { %v4171_v31 = vadd.f32 %v1562_v9, %v1449_v39 }
0x11ba   :  { %v1566_v30 = vpop.f32.mrb[32].mxu1 }
0x11bb   :  { %v4173_v12 = vadd.f32 %v1566_v30, %v1445_v33  ;;  %v1568_v18 = vpop.f32.mrb[33].mxu1 }
0x11bc   :  { %v4175_v21 = vadd.f32 %v1568_v18, %v1449_v39 }
0x11bd   :  { %v1956_v42 = vsel %vm3689_vm10, %v4169_v1, %v4173_v12  ;;  %v2070_v5 = vsel %vm3689_vm10, %v4173_v12, %v4169_v1 }
0x11be   :  { %v1572_v55 = vpop.f32.mrb[34].mxu1  ;;  %v1957_v61 = vsel %vm3695_vm11, %v4171_v31, %v4175_v21  ;;  %v2071_v27 = vsel %vm3695_vm11, %v4175_v21, %v4171_v31 }
0x11bf   :  { %v4193_v28 = vadd.f32 %v1572_v55, %v1445_v33  ;;  %v1574_v38 = vpop.f32.mrb[35].mxu1 }
0x11c0   :  { %v4195_v41 = vadd.f32 %v1574_v38, %v1449_v39 }
0x11c1   :  { %v1838_v45 = vsel %vm3689_vm10, %v4165_v40, %v4193_v28  ;;  %v2184_v8 = vsel %vm3689_vm10, %v4193_v28, %v4165_v40 }
0x11c2   :  { %v1578_v13 = vpop.f32.mrb[36].mxu1  ;;  %v1839_v19 = vsel %vm3695_vm11, %v4167_v26, %v4195_v41  ;;  %v2185_v34 = vsel %vm3695_vm11, %v4195_v41, %v4167_v26 }
0x11c3   :  { %v4213_v14 = vadd.f32 %v1578_v13, %v1445_v33  ;;  %v1580_v15 = vpop.f32.mrb[37].mxu1 }
0x11c4   :  { %v4215_v48 = vadd.f32 %v1580_v15, %v1449_v39 }
0x11c5   :  { %v1720_v54 = vsel %vm3689_vm10, %v4161_v23, %v4213_v14  ;;  %v2298_v60 = vsel %vm3689_vm10, %v4213_v14, %v4161_v23 }
0x11c6   :  { %v1584_v47 = vpop.f32.mrb[38].mxu1  ;;  %v1721_v50 = vsel %vm3695_vm11, %v4163_v25, %v4215_v48 }
0x11c7   :  { %v4235_v17 = vadd.f32 %v1584_v47, %v1445_v33  ;;  %v1586_v49 = vpop.f32.mrb[39].mxu1 }
0x11c8   :  { %v4239_v20 = vadd.f32 %v1586_v49, %v1449_v39 }
0x11c9   :  { %v1609_v52 = vsel %vm3689_vm10, %v4233_v24, %v4235_v17 }
0x11ca   :  { %v1682_v30 = vadd.f32 %v1677_v0, %v1609_v52  ;;  %v1610_v4 = vsel %vm3695_vm11, %v4237_v22, %v4239_v20  ;;  %v2413_v63 = vsel %vm3695_vm11, %v4239_v20, %v4237_v22  ;;  %v3364_v22 = vmov 0.0|0.0  }
0x11cb   :  { %v1683_v33 = vadd.f32 %v1679_v51, %v1610_v4 }
0x11cc   :  { %v2671_v39 = vmul.f32 -1.442695, %v1682_v30 }
0x11cd   :  { %v2672_v15 = vmul.f32 -1.442695, %v1683_v33 }
0x11ce   :  { %3230 = vpow2.f32 %v2671_v39 }
0x11cf   :  { %3232 = vtanh.f32 %v1683_v33 }
0x11d8   :  { %v3231_v18 = vpop.eup %3230 }
0x11d9   :  { %v1687_v55 = vadd.f32 1.0, %v3231_v18  ;;  %v3233_v38 = vpop.eup %3232 }
0x11db   :  { %3234 = vrcp.f32 %v1687_v55 }
0x11dc   :  { %3236 = vpow2.f32 %v2672_v15 }
0x11e5   :  { %v3235_v13 = vpop.eup %3234 }
0x11e6   :  { %v1698_v0 = vmul.f32 %v3235_v13, %v3233_v38  ;;  %v3237_v47 = vpop.eup %3236  ;;  %v1697_v52 = vmul.f32 0.0, %v3235_v13 }
0x11e7   :  { %v1694_v49 = vadd.f32 1.0, %v3237_v47 }
0x11e8   :  { %1700 = vrot.lane.b32.xlu1 %v1698_v0, %s3356_s4 }
0x11e9   :  { %3238 = vrcp.f32 %v1694_v49 }
0x11f3   :  { %v3239_v51 = vpop.eup %3238 }
0x125a   :  { %v1701_v9 = vpop.permute.xlu1 %1700 }
0x125b   :  { %v1703_v57 = vadd.f32 %v1701_v9, %v1697_v52 }
0x125d   :  { %3240 = vtanh.f32 %v1703_v57  ;;  %1712 = vrot.lane.b32.xlu1 %v1703_v57, %s3356_s4 }
0x1267   :  { %v3241_v30 = vpop.eup %3240 }
0x1268   :  { %v1705_v4 = vmul.f32 %v3241_v30, %v3239_v51 }
0x126a   :  { %1707 = vrot.lane.b32.xlu0 %v1705_v4, %s3356_s4 }
0x12cf   :  { %v1713_v39 = vpop.permute.xlu1 %1712 }
0x12d0   :  { %v1715_v33 = vsel %vm65_vm12, %v1713_v39, 0.0 }
0x12d1   :  { %1812 = vrot.lane.b32.xlu0 %v1715_v33, %s3356_s4 }
0x12dc   :  { %v1708_v18 = vpop.permute.xlu0 %1707 }
0x12dd   :  { %v1710_v9 = vsel %vm65_vm12, %v1708_v18, 0.0 }
0x12de   :  { %2673 = vmatmul.mubr.msk.f32.vlgmr.msra.gmra.mrb[18].mxu0 %vm453_vm14, %v1710_v9 }
0x12df   :  { %3027 = vmatpush1.bf16.msra.mxu0 %v4088_v2  ;;  %2025 = vmatprep.mubr.f32.mxu0 %v3355_v58 }
0x12e0   :  { %3029 = vmatprep.subr.bf16.mxu0 %v4093_v46 }
0x12e3   :  { %3031 = vmatpush1.bf16.msra.mxu0 %v4095_v11 }
0x12e4   :  { %3033 = vmatprep.subr.bf16.mxu0 %v4099_v62 }
0x12e7   :  { %3035 = vmatpush1.bf16.msra.mxu0 %v4101_v32 }
0x12e8   :  { %3037 = vmatprep.subr.bf16.mxu0 %v4105_v35 }
0x12eb   :  { %3039 = vmatpush1.bf16.msra.mxu0 %v4107_v16 }
0x12ec   :  { %3057 = vmatprep.subr.bf16.mxu0 %v4086_v6 }
0x1343   :  { %v1813_v4 = vpop.permute.xlu0 %1812 }
0x13b1   :  { %v1791_v44 = vpop.f32.mrb[18].mxu0 }
0x13b2   :  { %v1796_v57 = vadd.f32 %v1791_v44, %v1720_v54  ;;  %v1793_v55 = vpop.f32.mrb[19].mxu0 }
0x13b3   :  { %v1797_v38 = vadd.f32 %v1793_v55, %v1721_v50 }
0x13b4   :  { %v2674_v13 = vmul.f32 -1.442695, %v1796_v57 }
0x13b5   :  { %v2675_v51 = vmul.f32 -1.442695, %v1797_v38 }
0x13b6   :  { %3242 = vpow2.f32 %v2674_v13 }
0x13b7   :  { %3244 = vtanh.f32 %v1797_v38 }
0x13c0   :  { %v3243_v0 = vpop.eup %3242 }
0x13c1   :  { %v1801_v15 = vadd.f32 1.0, %v3243_v0  ;;  %v3245_v47 = vpop.eup %3244 }
0x13c3   :  { %3246 = vrcp.f32 %v1801_v15 }
0x13c4   :  { %3248 = vpow2.f32 %v2675_v51 }
0x13cd   :  { %v3247_v49 = vpop.eup %3246 }
0x13ce   :  { %v1816_v52 = vmul.f32 %v3247_v49, %v3245_v47  ;;  %v3249_v30 = vpop.eup %3248  ;;  %v1815_v18 = vmul.f32 %v3247_v49, %v1813_v4 }
0x13cf   :  { %v1808_v39 = vadd.f32 1.0, %v3249_v30 }
0x13d0   :  { %1818 = vrot.lane.b32.xlu1 %v1816_v52, %s3356_s4 }
0x13d1   :  { %3250 = vrcp.f32 %v1808_v39 }
0x13db   :  { %v3251_v50 = vpop.eup %3250 }
0x1442   :  { %v1819_v54 = vpop.permute.xlu1 %1818 }
0x1443   :  { %v1821_v44 = vadd.f32 %v1819_v54, %v1815_v18 }
0x1445   :  { %3252 = vtanh.f32 %v1821_v44  ;;  %1830 = vrot.lane.b32.xlu1 %v1821_v44, %s3356_s4 }
0x144f   :  { %v3253_v57 = vpop.eup %3252 }
0x1450   :  { %v1823_v55 = vmul.f32 %v3253_v57, %v3251_v50 }
0x1452   :  { %1825 = vrot.lane.b32.xlu0 %v1823_v55, %s3356_s4 }
0x14b7   :  { %v1831_v13 = vpop.permute.xlu1 %1830 }
0x14b8   :  { %v1833_v38 = vsel %vm67_vm15, %v1831_v13, %v1715_v33 }
0x14b9   :  { %1930 = vrot.lane.b32.xlu0 %v1833_v38, %s3356_s4 }
0x14c4   :  { %v1826_v0 = vpop.permute.xlu0 %1825 }
0x14c5   :  { %v1828_v15 = vsel %vm67_vm15, %v1826_v0, %v1710_v9 }
0x14c6   :  { %2676 = vmatmul.mubr.msk.f32.vlgmr.msra.gmra.mrb[40].mxu1 %vm453_vm14, %v1828_v15 }
0x14c7   :  { %3043 = vmatpush1.bf16.msra.mxu1 %v4088_v2  ;;  %2139 = vmatprep.mubr.f32.mxu1 %v3355_v58 }
0x14c8   :  { %3045 = vmatprep.subr.bf16.mxu1 %v4093_v46 }
0x14cb   :  { %3047 = vmatpush1.bf16.msra.mxu1 %v4095_v11 }
0x14cc   :  { %3049 = vmatprep.subr.bf16.mxu1 %v4099_v62 }
0x14cf   :  { %3051 = vmatpush1.bf16.msra.mxu1 %v4101_v32 }
0x14d0   :  { %3053 = vmatprep.subr.bf16.mxu1 %v4105_v35 }
0x14d3   :  { %3055 = vmatpush1.bf16.msra.mxu1 %v4107_v16 }
0x14d4   :  { %3073 = vmatprep.subr.bf16.mxu1 %v4086_v6 }
0x152b   :  { %v1931_v54 = vpop.permute.xlu0 %1930 }
0x1599   :  { %v1909_v7 = vpop.f32.mrb[40].mxu1 }
0x159a   :  { %v1914_v33 = vadd.f32 %v1909_v7, %v1838_v45  ;;  %v1911_v9 = vpop.f32.mrb[41].mxu1 }
0x159b   :  { %v1915_v47 = vadd.f32 %v1911_v9, %v1839_v19 }
0x159c   :  { %v2677_v49 = vmul.f32 -1.442695, %v1914_v33 }
0x159d   :  { %v2678_v18 = vmul.f32 -1.442695, %v1915_v47 }
0x159e   :  { %3254 = vpow2.f32 %v2677_v49 }
0x159f   :  { %3256 = vtanh.f32 %v1915_v47 }
0x15a8   :  { %v3255_v52 = vpop.eup %3254 }
0x15a9   :  { %v1919_v51 = vadd.f32 1.0, %v3255_v52  ;;  %v3257_v30 = vpop.eup %3256 }
0x15ab   :  { %3258 = vrcp.f32 %v1919_v51 }
0x15ac   :  { %3260 = vpow2.f32 %v2678_v18 }
0x15b5   :  { %v3259_v4 = vpop.eup %3258 }
0x15b6   :  { %v1934_v39 = vmul.f32 %v3259_v4, %v3257_v30  ;;  %v3261_v45 = vpop.eup %3260  ;;  %v1933_v50 = vmul.f32 %v3259_v4, %v1931_v54 }
0x15b7   :  { %v1926_v44 = vadd.f32 1.0, %v3261_v45 }
0x15b8   :  { %1936 = vrot.lane.b32.xlu1 %v1934_v39, %s3356_s4 }
0x15b9   :  { %3262 = vrcp.f32 %v1926_v44 }
0x15c3   :  { %v3263_v19 = vpop.eup %3262 }
0x162a   :  { %v1937_v57 = vpop.permute.xlu1 %1936 }
0x162b   :  { %v1939_v55 = vadd.f32 %v1937_v57, %v1933_v50 }
0x162d   :  { %3264 = vtanh.f32 %v1939_v55  ;;  %1948 = vrot.lane.b32.xlu1 %v1939_v55, %s3356_s4 }
0x1637   :  { %v3265_v13 = vpop.eup %3264 }
0x1638   :  { %v1941_v0 = vmul.f32 %v3265_v13, %v3263_v19 }
0x163a   :  { %1943 = vrot.lane.b32.xlu0 %v1941_v0, %s3356_s4 }
0x169f   :  { %v1949_v7 = vpop.permute.xlu1 %1948 }
0x16a0   :  { %v1951_v33 = vsel %vm69_vm1, %v1949_v7, %v1833_v38 }
0x16a1   :  { %2048 = vrot.lane.b32.xlu0 %v1951_v33, %s3356_s4 }
0x16ac   :  { %v1944_v9 = vpop.permute.xlu0 %1943 }
0x16ad   :  { %v1946_v47 = vsel %vm69_vm1, %v1944_v9, %v1828_v15 }
0x16ae   :  { %2679 = vmatmul.mubr.msk.f32.vlgmr.msra.gmra.mrb[20].mxu0 %vm453_vm14, %v1946_v47 }
0x16af   :  { %3059 = vmatpush1.bf16.msra.mxu0 %v4088_v2  ;;  %2253 = vmatprep.mubr.f32.mxu0 %v3355_v58 }
0x16b0   :  { %3061 = vmatprep.subr.bf16.mxu0 %v4093_v46 }
0x16b3   :  { %3063 = vmatpush1.bf16.msra.mxu0 %v4095_v11 }
0x16b4   :  { %3065 = vmatprep.subr.bf16.mxu0 %v4099_v62 }
0x16b7   :  { %3067 = vmatpush1.bf16.msra.mxu0 %v4101_v32 }
0x16b8   :  { %3069 = vmatprep.subr.bf16.mxu0 %v4105_v35 }
0x16bb   :  { %3071 = vmatpush1.bf16.msra.mxu0 %v4107_v16 }
0x16bc   :  { %3089 = vmatprep.subr.bf16.mxu0 %v4086_v6 }
0x1713   :  { %v2049_v45 = vpop.permute.xlu0 %2048 }
0x1781   :  { %v2027_v43 = vpop.f32.mrb[20].mxu0 }
0x1782   :  { %v2032_v38 = vadd.f32 %v2027_v43, %v1956_v42  ;;  %v2029_v15 = vpop.f32.mrb[21].mxu0 }
0x1783   :  { %v2033_v49 = vadd.f32 %v2029_v15, %v1957_v61 }
0x1784   :  { %v2680_v52 = vmul.f32 -1.442695, %v2032_v38 }
0x1785   :  { %v2681_v18 = vmul.f32 -1.442695, %v2033_v49 }
0x1786   :  { %3266 = vpow2.f32 %v2680_v52 }
0x1787   :  { %3268 = vtanh.f32 %v2033_v49 }
0x1790   :  { %v3267_v51 = vpop.eup %3266 }
0x1791   :  { %v2037_v30 = vadd.f32 1.0, %v3267_v51  ;;  %v3269_v6 = vpop.eup %3268 }
0x1793   :  { %3270 = vrcp.f32 %v2037_v30 }
0x1794   :  { %3272 = vpow2.f32 %v2681_v18 }
0x179d   :  { %v3271_v4 = vpop.eup %3270 }
0x179e   :  { %v2052_v39 = vmul.f32 %v3271_v4, %v3269_v6  ;;  %v3273_v42 = vpop.eup %3272  ;;  %v2051_v44 = vmul.f32 %v3271_v4, %v2049_v45 }
0x179f   :  { %v2044_v54 = vadd.f32 1.0, %v3273_v42 }
0x17a0   :  { %2054 = vrot.lane.b32.xlu1 %v2052_v39, %s3356_s4 }
0x17a1   :  { %3274 = vrcp.f32 %v2044_v54 }
0x17ab   :  { %v3275_v61 = vpop.eup %3274 }
0x1812   :  { %v2055_v50 = vpop.permute.xlu1 %2054 }
0x1813   :  { %v2057_v57 = vadd.f32 %v2055_v50, %v2051_v44 }
0x1815   :  { %3276 = vtanh.f32 %v2057_v57  ;;  %2066 = vrot.lane.b32.xlu1 %v2057_v57, %s3356_s4 }
0x181f   :  { %v3277_v55 = vpop.eup %3276 }
0x1820   :  { %v2059_v19 = vmul.f32 %v3277_v55, %v3275_v61 }
0x1822   :  { %2061 = vrot.lane.b32.xlu0 %v2059_v19, %s3356_s4 }
0x1887   :  { %v2067_v13 = vpop.permute.xlu1 %2066 }
0x1888   :  { %v2069_v0 = vsel %vm71_vm2, %v2067_v13, %v1951_v33 }
0x1889   :  { %2162 = vrot.lane.b32.xlu0 %v2069_v0, %s3356_s4 }
0x1894   :  { %v2062_v7 = vpop.permute.xlu0 %2061 }
0x1895   :  { %v2064_v9 = vsel %vm71_vm2, %v2062_v7, %v1946_v47 }
0x1896   :  { %2682 = vmatmul.mubr.msk.f32.vlgmr.msra.gmra.mrb[42].mxu1 %vm453_vm14, %v2064_v9 }
0x1897   :  { %3075 = vmatpush1.bf16.msra.mxu1 %v4088_v2  ;;  %2367 = vmatprep.mubr.f32.mxu1 %v3355_v58 }
0x1898   :  { %3077 = vmatprep.subr.bf16.mxu1 %v4093_v46 }
0x189b   :  { %3079 = vmatpush1.bf16.msra.mxu1 %v4095_v11 }
0x189c   :  { %3081 = vmatprep.subr.bf16.mxu1 %v4099_v62 }
0x189f   :  { %3083 = vmatpush1.bf16.msra.mxu1 %v4101_v32 }
0x18a0   :  { %3085 = vmatprep.subr.bf16.mxu1 %v4105_v35 }
0x18a3   :  { %3087 = vmatpush1.bf16.msra.mxu1 %v4107_v16 }
0x18a4   :  { %3104 = vmatprep.subr.bf16.mxu1 %v3364_v22 }
0x1969   :  { %v2141_v29 = vpop.f32.mrb[42].mxu1 }
0x196a   :  { %v2146_v33 = vadd.f32 %v2141_v29, %v2070_v5  ;;  %v2143_v47 = vpop.f32.mrb[43].mxu1  ;;  %v2163_v5 = vpop.permute.xlu0 %2162 }
0x196b   :  { %v2147_v43 = vadd.f32 %v2143_v47, %v2071_v27 }
0x196c   :  { %v2683_v38 = vmul.f32 -1.442695, %v2146_v33 }
0x196d   :  { %v2684_v1 = vmul.f32 -1.442695, %v2147_v43 }
0x196e   :  { %3278 = vpow2.f32 %v2683_v38  ;;  %v4492_v38 = vsel %vm3695_vm11, %v4215_v48, %v4163_v25 }
0x196f   :  { %3280 = vtanh.f32 %v2147_v43 }
0x1978   :  { %v3279_v15 = vpop.eup %3278 }
0x1979   :  { %v2151_v49 = vadd.f32 1.0, %v3279_v15  ;;  %v3281_v52 = vpop.eup %3280 }
0x197b   :  { %3282 = vrcp.f32 %v2151_v49 }
0x197c   :  { %3284 = vpow2.f32 %v2684_v1 }
0x1985   :  { %v3283_v51 = vpop.eup %3282 }
0x1986   :  { %v2166_v30 = vmul.f32 %v3283_v51, %v3281_v52  ;;  %v3285_v12 = vpop.eup %3284  ;;  %v2165_v4 = vmul.f32 %v3283_v51, %v2163_v5 }
0x1987   :  { %v2158_v6 = vadd.f32 1.0, %v3285_v12 }
0x1988   :  { %2168 = vrot.lane.b32.xlu1 %v2166_v30, %s3356_s4 }
0x1989   :  { %3286 = vrcp.f32 %v2158_v6 }
0x1993   :  { %v3287_v21 = vpop.eup %3286 }
0x19fa   :  { %v2169_v39 = vpop.permute.xlu1 %2168 }
0x19fb   :  { %v2171_v31 = vadd.f32 %v2169_v39, %v2165_v4 }
0x19fd   :  { %3288 = vtanh.f32 %v2171_v31  ;;  %2180 = vrot.lane.b32.xlu1 %v2171_v31, %s3356_s4 }
0x1a07   :  { %v3289_v27 = vpop.eup %3288 }
0x1a08   :  { %v2173_v18 = vmul.f32 %v3289_v27, %v3287_v21 }
0x1a0a   :  { %2175 = vrot.lane.b32.xlu0 %v2173_v18, %s3356_s4 }
0x1a6f   :  { %v2181_v42 = vpop.permute.xlu1 %2180 }
0x1a70   :  { %v2183_v45 = vsel %vm73_vm3, %v2181_v42, %v2069_v0 }
0x1a71   :  { %2276 = vrot.lane.b32.xlu0 %v2183_v45, %s3356_s4 }
0x1a7c   :  { %v2176_v54 = vpop.permute.xlu0 %2175 }
0x1a7d   :  { %v2178_v44 = vsel %vm73_vm3, %v2176_v54, %v2064_v9 }
0x1a7e   :  { %2685 = vmatmul.mubr.msk.f32.vlgmr.msra.gmra.mrb[22].mxu0 %vm453_vm14, %v2178_v44 }
0x1a7f   :  { %3091 = vmatpush1.bf16.msra.mxu0 %v4088_v2  ;;  %2481 = vmatprep.mubr.f32.mxu0 %v3355_v58 }
0x1a80   :  { %3093 = vmatprep.subr.bf16.mxu0 %v4093_v46 }
0x1a83   :  { %3095 = vmatpush1.bf16.msra.mxu0 %v4095_v11 }
0x1a84   :  { %3097 = vmatprep.subr.bf16.mxu0 %v4099_v62 }
0x1a87   :  { %3099 = vmatpush1.bf16.msra.mxu0 %v4101_v32 }
0x1a88   :  { %3101 = vmatprep.subr.bf16.mxu0 %v4105_v35 }
0x1a8b   :  { %3103 = vmatpush1.bf16.msra.mxu0 %v4107_v16 }
0x1b51   :  { %v2255_v37 = vpop.f32.mrb[22].mxu0 }
0x1b52   :  { %v2260_v2 = vadd.f32 %v2255_v37, %v2184_v8  ;;  %v2257_v50 = vpop.f32.mrb[23].mxu0  ;;  %v2277_v8 = vpop.permute.xlu0 %2276 }
0x1b53   :  { %v2261_v46 = vadd.f32 %v2257_v50, %v2185_v34 }
0x1b54   :  { %v2686_v11 = vmul.f32 -1.442695, %v2260_v2 }
0x1b55   :  { %v2687_v40 = vmul.f32 -1.442695, %v2261_v46 }
0x1b56   :  { %3290 = vpow2.f32 %v2686_v11 }
0x1b57   :  { %3292 = vtanh.f32 %v2261_v46 }
0x1b60   :  { %v3291_v62 = vpop.eup %3290 }
0x1b61   :  { %v2265_v32 = vadd.f32 1.0, %v3291_v62  ;;  %v3293_v35 = vpop.eup %3292 }
0x1b63   :  { %3294 = vrcp.f32 %v2265_v32  ;;  %v2525_v32 = vld [vmem:[%s4483_s9 + $0x20] sm:$0xff] }
0x1b64   :  { %3296 = vpow2.f32 %v2687_v40  ;;  %v2528_v40 = vld [vmem:[%s4483_s9 + $0x38] sm:$0xff] }
0x1b6d   :  { %v3295_v16 = vpop.eup %3294 }
0x1b6e   :  { %v2280_v57 = vmul.f32 %v3295_v16, %v3293_v35  ;;  %v3297_v28 = vpop.eup %3296  ;;  %v2279_v55 = vmul.f32 %v3295_v16, %v2277_v8  ;;  %v2526_v35 = vld [vmem:[%s4483_s9 + $0x28] sm:$0xff] }
0x1b6f   :  { %v2272_v61 = vadd.f32 1.0, %v3297_v28  ;;  %v3111_v16 = vpack.c.bf16 %v2526_v35, %v2525_v32 }
0x1b70   :  { %2282 = vrot.lane.b32.xlu1 %v2280_v57, %s3356_s4  ;;  %v2527_v57 = vld [vmem:[%s4483_s9 + $0x30] sm:$0xff] }
0x1b71   :  { %3298 = vrcp.f32 %v2272_v61  ;;  %v3114_v28 = vpack.c.bf16 %v2528_v40, %v2527_v57 }
0x1b7b   :  { %v3299_v41 = vpop.eup %3298 }
0x1be2   :  { %v2283_v19 = vpop.permute.xlu1 %2282 }
0x1be3   :  { %v2285_v26 = vadd.f32 %v2283_v19, %v2279_v55 }
0x1be5   :  { %3300 = vtanh.f32 %v2285_v26  ;;  %2294 = vrot.lane.b32.xlu1 %v2285_v26, %s3356_s4 }
0x1bef   :  { %v3301_v34 = vpop.eup %3300 }
0x1bf0   :  { %v2287_v13 = vmul.f32 %v3301_v34, %v3299_v41 }
0x1bf2   :  { %2289 = vrot.lane.b32.xlu0 %v2287_v13, %s3356_s4 }
0x1c57   :  { %v2295_v0 = vpop.permute.xlu1 %2294 }
0x1c58   :  { %v2297_v7 = vsel %vm75_vm4, %v2295_v0, %v2183_v45  ;;  %v4493_v45 = vsel %vm3689_vm10, %v4235_v17, %v4233_v24  ;;  %v2521_v24 = vld [vmem:[%s4483_s9] sm:$0xff]  ;;  %v2523_v17 = vld [vmem:[%s4483_s9 + $0x10] sm:$0xff] }
0x1c59   :  { %2390 = vrot.lane.b32.xlu0 %v2297_v7, %s3356_s4  ;;  %v3105_v20 = vpack.c.bf16 %v2522_v56, %v2521_v24 }
0x1c64   :  { %v2290_v9 = vpop.permute.xlu0 %2289 }
0x1c65   :  { %v2292_v29 = vsel %vm75_vm4, %v2290_v9, %v2178_v44 }
0x1c66   :  { %2688 = vmatmul.mubr.msk.f32.vlgmr.msra.gmra.mrb[44].mxu1 %vm453_vm14, %v2292_v29 }
0x1c67   :  { %3106 = vmatpush3.bf16.msra.mxu1 %v3105_v20  ;;  %2789 = vmatprep.mubr.msk.f32.mxu1 %vm3365_vm6, %v3355_v58 }
0x1c68   :  { %3107 = vmatprep.subr.bf16.mxu1 %v3364_v22 }
0x1d39   :  { %v2369_v33 = vpop.f32.mrb[44].mxu1 }
0x1d3a   :  { %v2374_v47 = vadd.f32 %v2369_v33, %v2298_v60  ;;  %v2371_v43 = vpop.f32.mrb[45].mxu1  ;;  %v2391_v60 = vpop.permute.xlu0 %2390  ;;  %v2694_v33 = vld [vmem:[%s4484_s10] ss:$0 sm:$0xff] }
0x1d3b   :  { %v2375_v15 = vadd.f32 %v2371_v43, %v4492_v38 }
0x1d3c   :  { %v2689_v49 = vmul.f32 -1.442695, %v2374_v47 }
0x1d3d   :  { %v2690_v23 = vmul.f32 -1.442695, %v2375_v15 }
0x1d3e   :  { %3302 = vpow2.f32 %v2689_v49 }
0x1d3f   :  { %3304 = vtanh.f32 %v2375_v15 }
0x1d48   :  { %v3303_v59 = vpop.eup %3302 }
0x1d49   :  { %v2379_v52 = vadd.f32 1.0, %v3303_v59  ;;  %v3305_v51 = vpop.eup %3304 }
0x1d4b   :  { %3306 = vrcp.f32 %v2379_v52 }
0x1d4c   :  { %3308 = vpow2.f32 %v2690_v23 }
0x1d55   :  { %v3307_v30 = vpop.eup %3306 }
0x1d56   :  { %v2394_v1 = vmul.f32 %v3307_v30, %v3305_v51  ;;  %v3309_v14 = vpop.eup %3308  ;;  %v2393_v5 = vmul.f32 %v3307_v30, %v2391_v60 }
0x1d57   :  { %v2386_v12 = vadd.f32 1.0, %v3309_v14 }
0x1d58   :  { %2396 = vrot.lane.b32.xlu1 %v2394_v1, %s3356_s4 }
0x1d59   :  { %3310 = vrcp.f32 %v2386_v12 }
0x1d63   :  { %v3311_v48 = vpop.eup %3310 }
0x1dca   :  { %v2397_v6 = vpop.permute.xlu1 %2396 }
0x1dcb   :  { %v2399_v25 = vadd.f32 %v2397_v6, %v2393_v5 }
0x1dcd   :  { %3312 = vtanh.f32 %v2399_v25  ;;  %2408 = vrot.lane.b32.xlu1 %v2399_v25, %s3356_s4 }
0x1dd7   :  { %v3313_v4 = vpop.eup %3312 }
0x1dd8   :  { %v2401_v39 = vmul.f32 %v3313_v4, %v3311_v48 }
0x1dda   :  { %2403 = vrot.lane.b32.xlu0 %v2401_v39, %s3356_s4 }
0x1e3f   :  { %v2409_v31 = vpop.permute.xlu1 %2408 }
0x1e40   :  { %v2411_v21 = vsel %vm77_vm5, %v2409_v31, %v2297_v7 }
0x1e41   :  { %2504 = vrot.lane.b32.xlu0 %v2411_v21, %s3356_s4 }
0x1e4c   :  { %v2404_v27 = vpop.permute.xlu0 %2403 }
0x1e4d   :  { %v2406_v18 = vsel %vm77_vm5, %v2404_v27, %v2292_v29 }
0x1e4e   :  { %2691 = vmatmul.mubr.msk.f32.vlgmr.msra.gmra.mrb[24].mxu0 %vm453_vm14, %v2406_v18 }
0x1eb3   :  { %v2505_v55 = vpop.permute.xlu0 %2504 }
0x1f21   :  { %v2483_v42 = vpop.f32.mrb[24].mxu0 }
0x1f22   :  { %v2488_v54 = vadd.f32 %v2483_v42, %v4493_v45  ;;  %v2485_v44 = vpop.f32.mrb[25].mxu0 }
0x1f23   :  { %v2489_v37 = vadd.f32 %v2485_v44, %v2413_v63  ;;  %v2524_v63 = vld [vmem:[%s4483_s9 + $0x18] sm:$0xff] }
0x1f24   :  { %v2692_v2 = vmul.f32 -1.442695, %v2488_v54  ;;  %v3108_v62 = vpack.c.bf16 %v2524_v63, %v2523_v17 }
0x1f25   :  { %v2693_v8 = vmul.f32 -1.442695, %v2489_v37 }
0x1f26   :  { %3314 = vpow2.f32 %v2692_v2  ;;  %3109 = vmatpush3.bf16.msra.mxu1 %v3108_v62 }
0x1f27   :  { %3316 = vtanh.f32 %v2489_v37  ;;  %3110 = vmatprep.subr.bf16.mxu1 %v3364_v22 }
0x1f2a   :  { %3112 = vmatpush3.bf16.msra.mxu1 %v3111_v16 }
0x1f2b   :  { %3113 = vmatprep.subr.bf16.mxu1 %v3364_v22 }
0x1f2e   :  { %3115 = vmatpush3.bf16.msra.mxu1 %v3114_v28 }
0x1f30   :  { %v3315_v10 = vpop.eup %3314 }
0x1f31   :  { %v2493_v50 = vadd.f32 1.0, %v3315_v10  ;;  %v3317_v46 = vpop.eup %3316 }
0x1f33   :  { %3318 = vrcp.f32 %v2493_v50 }
0x1f34   :  { %3320 = vpow2.f32 %v2693_v8 }
0x1f3d   :  { %v3319_v11 = vpop.eup %3318 }
0x1f3e   :  { %v2508_v53 = vmul.f32 %v3319_v11, %v3317_v46  ;;  %v3321_v61 = vpop.eup %3320  ;;  %v2507_v26 = vmul.f32 %v3319_v11, %v2505_v55 }
0x1f3f   :  { %v2500_v19 = vadd.f32 1.0, %v3321_v61 }
0x1f40   :  { %2510 = vrot.lane.b32.xlu1 %v2508_v53, %s3356_s4 }
0x1f41   :  { %3322 = vrcp.f32 %v2500_v19 }
0x1f4b   :  { %v3323_v13 = vpop.eup %3322 }
0x1fb2   :  { %v2511_v41 = vpop.permute.xlu1 %2510 }
0x1fb3   :  { %v2513_v34 = vadd.f32 %v2511_v41, %v2507_v26 }
0x1fb5   :  { %3324 = vtanh.f32 %v2513_v34 }
0x1fbf   :  { %v3325_v0 = vpop.eup %3324 }
0x1fc0   :  { %v2515_v7 = vmul.f32 %v3325_v0, %v3323_v13 }
0x1fc2   :  { %2517 = vrot.lane.b32.xlu0 %v2515_v7, %s3356_s4 }
0x2034   :  { %v2518_v9 = vpop.permute.xlu0 %2517 }
0x2035   :  { %v2520_v29 = vsel %vm79_vm0, %v2518_v9, %v2406_v18 }
0x2036   :  { %2790 = vmatmul.mubr.msk.f32.vlgmr.msra.gmra.mrb[46].mxu1 %vm453_vm14, %v2520_v29 }
0x2109   :  { %v2605_v47 = vpop.f32.mrb[46].mxu1 }
0x210a   :  { %v2606_v43 = vadd.f32 %v2694_v33, %v2605_v47  ;;  %v2791_v58 = vpop.f32.mrb[47].mxu1 }
0x210c   :  { %2610 = vst.msk [vmem:[%s4485_s11] sm:$0xff] %vm2609_vm7, %v2606_v43 }
0x210d   :  { %2615 = vsyncpa [#allocation5], 1 }

</bundles_post_ra>
